<compile_context>
chip_gen: v7x
topology: tpu7x:2x2x1
jax: 0.10.0
libtpu: 0.0.40
codegen_flags: <defaults>
</compile_context>

<pallas_src>
import jax
import jax.numpy as jnp
from jax.experimental import pallas as pl
from jax.experimental.pallas import tpu as pltpu

EPS = 1e-5


def conv_stats_kernel(x_ref, w_ref, y_ref, stats_ref):
    # x_ref:     (1, H+2, W+2, Cin)  zero-padded NHWC image (one batch element)
    # w_ref:     (9*Cin, Cout)       im2col-packed conv weights
    # y_ref:     (1, H*W, Cout)      conv output for this image
    # stats_ref: (1, 2, Cout)        per-image [sum, sum_of_squares] over H*W
    _, Hp, Wp, Cin = x_ref.shape
    H, W = Hp - 2, Wp - 2

    x = x_ref[0]  # (Hp, Wp, Cin), single VMEM load of the padded slab

    # Build im2col rows in VMEM (no HBM replication): 9 shifted HxW windows,
    # channel-concatenated in (kh, kw, ci) order to match the weight packing.
    cols = []
    for kh in range(3):
        for kw in range(3):
            cols.append(x[kh:kh + H, kw:kw + W, :].reshape(H * W, Cin))
    xi = jnp.concatenate(cols, axis=-1)          # (H*W, 9*Cin)

    # Single MXU matmul, K = 9*Cin, accumulation stays in the MXU (f32).
    # (Conv bias omitted on purpose: exactly cancelled by BN mean subtraction.)
    acc = jnp.dot(xi, w_ref[...], preferred_element_type=jnp.float32)

    # NOTE: for Cout < 128 this store is sub-lane-dense; at production Cout
    # (>=128) it becomes unmasked.  Pass 2 below is always lane-dense.
    y_ref[0] = acc

    s = jnp.sum(acc, axis=0, keepdims=True)          # (1, Cout)
    ss = jnp.sum(acc * acc, axis=0, keepdims=True)   # (1, Cout)
    stats_ref[0] = jnp.concatenate([s, ss], axis=0)  # (2, Cout)


def bn_relu_kernel(y_ref, scale_ref, shift_ref, o_ref):
    # Single FMA-style sweep + ReLU; scale/shift already fold mean/var/gamma.
    o_ref[...] = jnp.maximum(y_ref[...] * scale_ref[...] + shift_ref[...], 0.0)


def _pick_row_tile(rows, max_tile=1024):
    """Largest row tile <= max_tile that is a multiple of 8 and divides rows."""
    if rows <= max_tile:
        return rows
    start = max_tile - (max_tile % 8)
    for t in range(start, 7, -8):
        if rows % t == 0:
            return t
    return rows


def unit_forward(x_nchw, w_oihw, bias, gamma, beta):
    """Pallas implementation of Unit.forward. Input/output are NCHW float32."""
    del bias  # mathematically cancelled by training-mode BatchNorm (see header)
    N, Cin, H, W = x_nchw.shape
    Cout = w_oihw.shape[0]
    HW = H * W

    # --- glue: layout only (transpose / pad / weight repack) ---
    x_nhwc = jnp.transpose(x_nchw, (0, 2, 3, 1)).astype(jnp.float32)
    xp = jnp.pad(x_nhwc, ((0, 0), (1, 1), (1, 1), (0, 0)))       # padding=1
    # (Cout,Cin,KH,KW) -> (KH,KW,Cin,Cout) -> (9*Cin, Cout); matches im2col order
    w_mat = jnp.transpose(w_oihw, (2, 3, 1, 0)).reshape(9 * Cin, Cout)
    w_mat = w_mat.astype(jnp.float32)

    # --- pass 1: conv (single matmul per image) + per-image BN partials ---
    y, stats = pl.pallas_call(
        conv_stats_kernel,
        out_shape=(jax.ShapeDtypeStruct((N, HW, Cout), jnp.float32),
                   jax.ShapeDtypeStruct((N, 2, Cout), jnp.float32)),
        grid=(N,),
        in_specs=[
            pl.BlockSpec((1, H + 2, W + 2, Cin), lambda n: (n, 0, 0, 0)),
            pl.BlockSpec((9 * Cin, Cout), lambda n: (0, 0)),
        ],
        out_specs=(
            pl.BlockSpec((1, HW, Cout), lambda n: (n, 0, 0)),
            pl.BlockSpec((1, 2, Cout), lambda n: (n, 0, 0)),
        ),
        compiler_params=pltpu.CompilerParams(
            dimension_semantics=("parallel",)),
    )(xp, w_mat)

    # --- glue: fold global batch stats into per-channel scale/shift (Cout-sized) ---
    count = jnp.float32(N * HW)
    tot = jnp.sum(stats, axis=0)                     # (2, Cout)
    mean = tot[0] / count
    var = tot[1] / count - mean * mean               # biased var (PyTorch training BN)
    scale = gamma.astype(jnp.float32) * jax.lax.rsqrt(var + EPS)
    shift = beta.astype(jnp.float32) - mean * scale

    # --- pass 2: lane-dense normalize + ReLU ---
    rows = N * H
    lanes = W * Cout
    y2 = y.reshape(rows, lanes)                      # free, contiguous reshape
    scale_t = jnp.tile(scale, (W,)).reshape(1, lanes)
    shift_t = jnp.tile(shift, (W,)).reshape(1, lanes)
    tr = _pick_row_tile(rows)

    out2 = pl.pallas_call(
        bn_relu_kernel,
        out_shape=jax.ShapeDtypeStruct((rows, lanes), jnp.float32),
        grid=(rows // tr,),
        in_specs=[
            pl.BlockSpec((tr, lanes), lambda i: (i, 0)),
            pl.BlockSpec((1, lanes), lambda i: (0, 0)),
            pl.BlockSpec((1, lanes), lambda i: (0, 0)),
        ],
        out_specs=pl.BlockSpec((tr, lanes), lambda i: (i, 0)),
        compiler_params=pltpu.CompilerParams(
            dimension_semantics=("parallel",)),
    )(y2, scale_t, shift_t)

    # --- glue: back to NCHW ---
    return jnp.transpose(out2.reshape(N, H, W, Cout), (0, 3, 1, 2))


def unit_forward_ref(x_nchw, w_oihw, bias, gamma, beta):
    """Pure-JAX reference (conv + bias + training-mode BN + ReLU)."""
    y = jax.lax.conv_general_dilated(
        x_nchw, w_oihw, window_strides=(1, 1), padding=((1, 1), (1, 1)),
        dimension_numbers=("NCHW", "OIHW", "NCHW"))
    y = y + bias[None, :, None, None]
    mean = jnp.mean(y, axis=(0, 2, 3), keepdims=True)
    var = jnp.mean(jnp.square(y - mean), axis=(0, 2, 3), keepdims=True)
    y = (y - mean) * jax.lax.rsqrt(var + EPS)
    y = y * gamma[None, :, None, None] + beta[None, :, None, None]
    return jnp.maximum(y, 0.0)


if __name__ == "__main__":
    # Small shapes consistent with the module: batch=2, Cin=4, Cout=8, 16x16.
    N, Cin, Cout, H, W = 2, 4, 8, 16, 16

    key = jax.random.PRNGKey(0)
    kx, kw, kb, kg, kbeta = jax.random.split(key, 5)
    x = jax.random.normal(kx, (N, Cin, H, W), dtype=jnp.float32)
    w = jax.random.normal(kw, (Cout, Cin, 3, 3), dtype=jnp.float32) * 0.1
    b = jax.random.normal(kb, (Cout,), dtype=jnp.float32) * 0.1
    gamma = 1.0 + 0.1 * jax.random.normal(kg, (Cout,), dtype=jnp.float32)
    beta = 0.1 * jax.random.normal(kbeta, (Cout,), dtype=jnp.float32)
    # TODO(synk): BatchNorm running_mean/running_var buffer updates (a training
    # side-effect) are not emitted; only the forward output is reproduced.

    out = jax.block_until_ready(unit_forward(x, w, b, gamma, beta))
    ref = jax.block_until_ready(unit_forward_ref(x, w, b, gamma, beta))

    assert out.shape == (N, Cout, H, W), out.shape
    assert jnp.allclose(out, ref, atol=1e-4, rtol=1e-4), (
        float(jnp.max(jnp.abs(out - ref))))
    print("KERNEL_OK")
</pallas_src>

<mosaic_0001>
module attributes {stable_mosaic.version = 11 : i64} {
  func.func @conv_stats_kernel(%arg0: i32, %arg1: memref<1x18x18x4xf32, #tpu.memory_space<vmem>>, %arg2: memref<36x8xf32, #tpu.memory_space<vmem>>, %arg3: memref<1x256x8xf32, #tpu.memory_space<vmem>>, %arg4: memref<1x2x8xf32, #tpu.memory_space<vmem>>) attributes {dimension_semantics = [#tpu.dimension_semantics<parallel>], iteration_bounds = array<i64: 2>, scalar_prefetch = 0 : i64, scratch_operands = 0 : i64, tpu.core_type = #tpu.core_type<tc>, window_params = [{transform_indices = @transform_0, window_bounds = array<i64: 1, 18, 18, 4>}, {pipeline_mode = #tpu.pipeline_mode<synchronous>, transform_indices = @transform_1, window_bounds = array<i64: 36, 8>}, {transform_indices = @transform_2, window_bounds = array<i64: 1, 256, 8>}, {transform_indices = @transform_3, window_bounds = array<i64: 1, 2, 8>}]} {
    %c0 = arith.constant 0 : index
    %c0_0 = arith.constant 0 : index
    %c0_1 = arith.constant 0 : index
    %c0_2 = arith.constant 0 : index
    %0 = vector.load %arg1[%c0, %c0_0, %c0_1, %c0_2] : memref<1x18x18x4xf32, #tpu.memory_space<vmem>>, vector<1x18x18x4xf32>
    %1 = vector.shape_cast %0 : vector<1x18x18x4xf32> to vector<18x18x4xf32>
    %2 = vector.extract_strided_slice %1 {offsets = [0, 0, 0], sizes = [16, 16, 4], strides = [1, 1, 1]} : vector<18x18x4xf32> to vector<16x16x4xf32>
    %3 = vector.shape_cast %2 : vector<16x16x4xf32> to vector<256x4xf32>
    %4 = vector.extract_strided_slice %1 {offsets = [0, 1, 0], sizes = [16, 16, 4], strides = [1, 1, 1]} : vector<18x18x4xf32> to vector<16x16x4xf32>
    %5 = vector.shape_cast %4 : vector<16x16x4xf32> to vector<256x4xf32>
    %6 = vector.extract_strided_slice %1 {offsets = [0, 2, 0], sizes = [16, 16, 4], strides = [1, 1, 1]} : vector<18x18x4xf32> to vector<16x16x4xf32>
    %7 = vector.shape_cast %6 : vector<16x16x4xf32> to vector<256x4xf32>
    %8 = vector.extract_strided_slice %1 {offsets = [1, 0, 0], sizes = [16, 16, 4], strides = [1, 1, 1]} : vector<18x18x4xf32> to vector<16x16x4xf32>
    %9 = vector.shape_cast %8 : vector<16x16x4xf32> to vector<256x4xf32>
    %10 = vector.extract_strided_slice %1 {offsets = [1, 1, 0], sizes = [16, 16, 4], strides = [1, 1, 1]} : vector<18x18x4xf32> to vector<16x16x4xf32>
    %11 = vector.shape_cast %10 : vector<16x16x4xf32> to vector<256x4xf32>
    %12 = vector.extract_strided_slice %1 {offsets = [1, 2, 0], sizes = [16, 16, 4], strides = [1, 1, 1]} : vector<18x18x4xf32> to vector<16x16x4xf32>
    %13 = vector.shape_cast %12 : vector<16x16x4xf32> to vector<256x4xf32>
    %14 = vector.extract_strided_slice %1 {offsets = [2, 0, 0], sizes = [16, 16, 4], strides = [1, 1, 1]} : vector<18x18x4xf32> to vector<16x16x4xf32>
    %15 = vector.shape_cast %14 : vector<16x16x4xf32> to vector<256x4xf32>
    %16 = vector.extract_strided_slice %1 {offsets = [2, 1, 0], sizes = [16, 16, 4], strides = [1, 1, 1]} : vector<18x18x4xf32> to vector<16x16x4xf32>
    %17 = vector.shape_cast %16 : vector<16x16x4xf32> to vector<256x4xf32>
    %18 = vector.extract_strided_slice %1 {offsets = [2, 2, 0], sizes = [16, 16, 4], strides = [1, 1, 1]} : vector<18x18x4xf32> to vector<16x16x4xf32>
    %19 = vector.shape_cast %18 : vector<16x16x4xf32> to vector<256x4xf32>
    %20 = tpu.concatenate %3, %5, %7, %9, %11, %13, %15, %17, %19 in 1 : vector<256x4xf32>, vector<256x4xf32>, vector<256x4xf32>, vector<256x4xf32>, vector<256x4xf32>, vector<256x4xf32>, vector<256x4xf32>, vector<256x4xf32>, vector<256x4xf32> -> vector<256x36xf32>
    %c0_3 = arith.constant 0 : index
    %c0_4 = arith.constant 0 : index
    %21 = vector.load %arg2[%c0_3, %c0_4] : memref<36x8xf32, #tpu.memory_space<vmem>>, vector<36x8xf32>
    %cst = arith.constant dense<0.000000e+00> : vector<256x8xf32>
    %22 = tpu.matmul %20, %21, %cst {dimension_numbers = #tpu.dot_dimension_numbers<[1], [0], [0], [1], [0, 0, 1, 1], [], []>} : vector<256x36xf32>, vector<36x8xf32>, vector<256x8xf32> -> vector<256x8xf32>
    %c0_5 = arith.constant 0 : index
    %c0_6 = arith.constant 0 : index
    %c0_7 = arith.constant 0 : index
    %23 = vector.load %arg3[%c0_5, %c0_6, %c0_7] : memref<1x256x8xf32, #tpu.memory_space<vmem>>, vector<1x256x8xf32>
    %24 = vector.shape_cast %23 : vector<1x256x8xf32> to vector<256x8xf32>
    %25 = vector.shape_cast %22 : vector<256x8xf32> to vector<1x256x8xf32>
    tpu.vector_store %arg3[%c0_5, %c0_6, %c0_7], %25 {strides = array<i32>} : memref<1x256x8xf32, #tpu.memory_space<vmem>>, vector<1x256x8xf32>,
    %cst_8 = arith.constant dense<0.000000e+00> : vector<8xf32>
    %26 = vector.multi_reduction <add>, %22, %cst_8 [0] : vector<256x8xf32> to vector<8xf32>
    %27 = vector.shape_cast %26 : vector<8xf32> to vector<1x8xf32>
    %28 = arith.mulf %22, %22 : vector<256x8xf32>
    %cst_9 = arith.constant dense<0.000000e+00> : vector<8xf32>
    %29 = vector.multi_reduction <add>, %28, %cst_9 [0] : vector<256x8xf32> to vector<8xf32>
    %30 = vector.shape_cast %29 : vector<8xf32> to vector<1x8xf32>
    %31 = tpu.concatenate %27, %30 in 0 : vector<1x8xf32>, vector<1x8xf32> -> vector<2x8xf32>
    %c0_10 = arith.constant 0 : index
    %c0_11 = arith.constant 0 : index
    %c0_12 = arith.constant 0 : index
    %32 = vector.load %arg4[%c0_10, %c0_11, %c0_12] : memref<1x2x8xf32, #tpu.memory_space<vmem>>, vector<1x2x8xf32>
    %33 = vector.shape_cast %32 : vector<1x2x8xf32> to vector<2x8xf32>
    %34 = vector.shape_cast %31 : vector<2x8xf32> to vector<1x2x8xf32>
    tpu.vector_store %arg4[%c0_10, %c0_11, %c0_12], %34 {strides = array<i32>} : memref<1x2x8xf32, #tpu.memory_space<vmem>>, vector<1x2x8xf32>,
    return
  }
  func.func @transform_0(%arg0: i32) -> (i32, i32, i32, i32) {
    %c0_i32 = arith.constant 0 : i32
    %c0_i32_0 = arith.constant 0 : i32
    %c0_i32_1 = arith.constant 0 : i32
    %c0_i32_2 = arith.constant 0 : i32
    return %arg0, %c0_i32, %c0_i32_0, %c0_i32_1 : i32, i32, i32, i32
  }
  func.func @transform_1(%arg0: i32) -> (i32, i32) {
    %c0_i32 = arith.constant 0 : i32
    %c0_i32_0 = arith.constant 0 : i32
    %c0_i32_1 = arith.constant 0 : i32
    return %c0_i32, %c0_i32_0 : i32, i32
  }
  func.func @transform_2(%arg0: i32) -> (i32, i32, i32) {
    %c0_i32 = arith.constant 0 : i32
    %c0_i32_0 = arith.constant 0 : i32
    %c0_i32_1 = arith.constant 0 : i32
    return %arg0, %c0_i32, %c0_i32_0 : i32, i32, i32
  }
  func.func @transform_3(%arg0: i32) -> (i32, i32, i32) {
    %c0_i32 = arith.constant 0 : i32
    %c0_i32_0 = arith.constant 0 : i32
    %c0_i32_1 = arith.constant 0 : i32
    return %arg0, %c0_i32, %c0_i32_0 : i32, i32, i32
  }
}

</mosaic_0001>

<bundles_post_ra>
// kernel: tpu_custom_call.1
= control target key start
LH: loop header
LB: loop body
LE: loop exit
PB: predicated region body
PF: predicated region fallthrough
CT: control target
= control target key end

     0   :  { %9 = vsyncpa [#allocation3], 0  ;;  %s4271_s0 = inlined_call_operand.vmem [shape: f32[2,18,18,4], index: 0, kind: input, shape index: {}]   ;;  %s4272_s1 = inlined_call_operand.vmem [shape: f32[36,8], index: 1, kind: input, shape index: {}]   ;;  %s4273_s2 = inlined_call_operand.vmem [shape: f32[2,256,8], index: 2, kind: output, shape index: {0}]   ;;  %s4274_s3 = inlined_call_operand.hbm [shape: f32[2,2,8], index: 3, kind: output, shape index: {1}]  }
   0x1   :  { %11 = vsyncpa [#allocation3 + $0x1], 0  ;;  %s2472_s12 = smov 0   ;;  %s2474_s13 = smov 0  }
   0x2   :  { %s2476_s14 = smov 0   ;;  %s2478_s15 = smov 0  }
   0x3 LB: > { %s2493_s16 = sadd.s32 4294967295, %s2441_s15   ;;  %s2147_s17 = sadd.s32 4294967294, %s2441_s15   ;;  %s2441_s15 = sphi %s2478_s15, %s4516_s15   ;;  %s2437_s14 = sphi %s2476_s14, %s4515_s14   ;;  %s2433_s13 = sphi %s2474_s13, %s4514_s13   ;;  %s2429_s12 = sphi %s2472_s12, %s4513_s12  }
   0x4   : > { %s2497_s18 = sadd.s32 1, %s2441_s15   ;;  %s97_s19 = sadd.s32 1, %s2437_s14 }
   0x5   : > { %s94_s20 = ssub.s32 %s2441_s15, %s2497_s18  ;;  %p107_p0 = scmp.ne.s32.totalorder %s2437_s14, %s2433_s13 }
   0x6   : > { %p95_p1 = scmp.eq.s32.totalorder %s94_s20, 0  ;;  %p108_p2 = scmp.eq.s32.totalorder %s2493_s16, 1 }
   0x7   : > { %p113_p3 = scmp.ne.s32.totalorder %s2433_s13, %s2429_s12  ;;  %p114_p4 = scmp.eq.s32.totalorder %s2147_s17, 1 }
   0x8   : > { %s2508_s21 = scalar_select %p95_p1, %s2437_s14, %s97_s19  }
   0x9   : > { %p2510_p5 = por %p108_p2, %p107_p0  ;;  %p2514_p6 = por %p114_p4, %p113_p3 }
   0xa   : > { %p2150_p7 = scmp.ge.s32.totalorder %s2441_s15, 1  ;;  %p143_p8 = scmp.lt.s32.totalorder %s2441_s15, 3 }
   0xc   : > { %p144_p9 = pnand %p2150_p7, %p143_p8 }
   0xe   : > { %147 = sbr.rel (%p144_p9) target bundleno = 905 (0x389), region = 28 }
  0x15   : > { %p172_p10 = scmp.lt.s32.totalorder %s2493_s16, 1  ;;  %vm284_vm0 = vcmask 1046528   ;;  %s2443_s29 = smov 4   ;;  %vm365_vm1 = vcmask 1045504   ;;  %vm1606_vm2 = vcmask 1043456   ;;  %vm1240_vm3 = vcmask 31744  }
  0x16   : > { %s2444_s30 = smov 8   ;;  %s2445_s4 = smov 12   ;;  %vm1273_vm4 = vcmask 64512   ;;  %vm1306_vm5 = vcmask 97280   ;;  %vm1339_vm6 = vcmask 130048   ;;  %vm1372_vm7 = vcmask 162816  }
  0x17   : > { %s2522_s24 = scalar_select %p172_p10, %s2493_s16, 1  ;;  %vm1405_vm8 = vcmask 195584   ;;  %vm1438_vm9 = vcmask 228352   ;;  %vm1471_vm10 = vcmask 261120   ;;  %vm1509_vm11 = vcmask 293888  }
  0x18   : > { %s2446_s5 = smov 16   ;;  %s2447_s10 = smov 20   ;;  %vm2037_vm12 = vcmask 1040384   ;;  %vm2039_vm13 = vcmask 58368  }
  0x19   : > { %s2302_s25 = smul.u32 432, %s2522_s24  ;;  %s2189_s8 = sshll.u32 %s2493_s16, 5 }
  0x1a   : > { %s4229_s19 = scalar_lea.hbm %s4274_s3, %s2189_s8 }
  0x1b   : > { %s2528_s28 = scalar_lea.vmem %s4271_s0, %s2302_s25  ;;  %s2448_s25 = smov 24  }
  0x1c   : > { %v2531_v0 = vld [vmem:[%s2528_s28 + $0x18] sm:$0xff]  ;;  %v2534_v1 = vld [vmem:[%s2528_s28 + $0x20] sm:$0xff]  ;;  %v2542_v5 = vld [vmem:[%s2528_s28 + $0x8] sm:$0xff] }
  0x1d   : > { %v2537_v2 = vld [vmem:[%s2528_s28] sm:$0xff]  ;;  %v290_v3 = vrot.slane %v2531_v0, 1  ;;  %v291_v4 = vrot.slane %v2534_v1, 1  ;;  %4352 = vst [vmem:[#allocation6_spill] sm:$0xff] %v2542_v5  ;;  %v2546_v7 = vld [vmem:[%s2528_s28 + $0x28] sm:$0x3] }
  0x1e   : > { %4351 = vst [vmem:[#allocation5_spill] sm:$0xff] %v2537_v2  ;;  %v285_v6 = vrot.slane %v2537_v2, 1  ;;  %v286_v8 = vrot.slane %v2542_v5, 1  ;;  %v293_v9 = vrot.slane %v2546_v7, 1  ;;  %v2551_v10 = vld [vmem:[%s2528_s28 + $0x10] sm:$0x3] }
  0x1f   : > { %v2554_v11 = vld [vmem:[%s2528_s28 + $0x38] sm:$0xff]  ;;  %v2557_v12 = vsel %vm284_vm0, %v290_v3, %v291_v4  ;;  %v288_v13 = vrot.slane %v2551_v10, 1  ;;  %v2561_v14 = vld [vmem:[%s2528_s28 + $0x40] sm:$0x3]  ;;  %v2564_v15 = vld [vmem:[%s2528_s28 + $0x30] sm:$0xff] }
  0x20   : > { %476 = vrot.lane.b32.xlu1 %v2557_v12, %s2443_s29  ;;  %v287_v16 = vsel %vm284_vm0, %v285_v6, %v286_v8  ;;  %v2571_v17 = vsel %vm284_vm0, %v291_v4, %v293_v9  ;;  %v296_v18 = vrot.slane %v2554_v11, 1  ;;  %v298_v19 = vrot.slane %v2561_v14, 1  ;;  %v2578_v22 = vld [vmem:[%s2528_s28 + $0x50] sm:$0xff]  ;;  %v2581_v23 = vld [vmem:[%s2528_s28 + $0x58] sm:$0x3]  ;;  %v2584_v24 = vld [vmem:[%s2528_s28 + $0x48] sm:$0xff] }
  0x21   : > { %472 = vrot.lane.b32.xlu0 %v287_v16, %s2443_s29  ;;  %v289_v20 = vsel %vm284_vm0, %v286_v8, %v288_v13  ;;  %v295_v21 = vrot.slane %v2564_v15, 1  ;;  %v301_v26 = vrot.slane %v2578_v22, 1  ;;  %v303_v27 = vrot.slane %v2581_v23, 1  ;;  %v2599_v30 = vld [vmem:[%s2528_s28 + $0x68] sm:$0xff]  ;;  %v2602_v31 = vld [vmem:[%s2528_s28 + $0x70] sm:$0x3] }
  0x22   : > { %v2590_v25 = vsel %vm284_vm0, %v296_v18, %v298_v19  ;;  %v300_v29 = vrot.slane %v2584_v24, 1  ;;  %v2605_v32 = vld [vmem:[%s2528_s28 + $0x60] sm:$0xff]  ;;  %v306_v34 = vrot.slane %v2599_v30, 1  ;;  %v308_v35 = vrot.slane %v2602_v31, 1  ;;  %v2624_v39 = vld [vmem:[%s2528_s28 + $0x88] sm:$0x3] }
  0x23   : > { %v2595_v28 = vsel %vm284_vm0, %v295_v21, %v296_v18  ;;  %v2612_v33 = vsel %vm284_vm0, %v301_v26, %v303_v27  ;;  %v305_v37 = vrot.slane %v2605_v32, 1  ;;  %v2621_v38 = vld [vmem:[%s2528_s28 + $0x80] sm:$0xff]  ;;  %v2627_v40 = vld [vmem:[%s2528_s28 + $0x78] sm:$0xff]  ;;  %v313_v43 = vrot.slane %v2624_v39, 1  ;;  %v2649_v48 = vld [vmem:[%s2528_s28 + $0x90] sm:$0xff] }
  0x24   : > { %478 = vrot.lane.b32.xlu1 %v2571_v17, %s2443_s29  ;;  %4353 = vst [vmem:[#allocation7_spill] sm:$0xff] %v2612_v33  ;;  %v2617_v36 = vsel %vm284_vm0, %v300_v29, %v301_v26  ;;  %v2634_v41 = vsel %vm284_vm0, %v306_v34, %v308_v35  ;;  %v311_v42 = vrot.slane %v2621_v38, 1  ;;  %v310_v45 = vrot.slane %v2627_v40, 1  ;;  %v2643_v46 = vld [vmem:[%s2528_s28 + $0x98] sm:$0xff]  ;;  %v2646_v47 = vld [vmem:[%s2528_s28 + $0xa0] sm:$0x3] }
  0x25   : > { %474 = vrot.lane.b32.xlu0 %v289_v20, %s2443_s29  ;;  %4354 = vst [vmem:[#allocation8_spill] sm:$0xff] %v2634_v41  ;;  %v2639_v44 = vsel %vm284_vm0, %v305_v37, %v306_v34  ;;  %v316_v50 = vrot.slane %v2643_v46, 1  ;;  %v318_v51 = vrot.slane %v2646_v47, 1  ;;  %v315_v53 = vrot.slane %v2649_v48, 1  ;;  %v2665_v54 = vld [vmem:[%s2528_s28 + $0xb0] sm:$0xff]  ;;  %v2671_v56 = vld [vmem:[%s2528_s28 + $0xa8] sm:$0xff] }
  0x26   : > { %4355 = vst [vmem:[#allocation9_spill] sm:$0xff] %v2639_v44  ;;  %v2656_v49 = vsel %vm284_vm0, %v311_v42, %v313_v43  ;;  %v2661_v52 = vsel %vm284_vm0, %v310_v45, %v311_v42  ;;  %v2668_v55 = vld [vmem:[%s2528_s28 + $0xb8] sm:$0x3]  ;;  %v321_v58 = vrot.slane %v2665_v54, 1  ;;  %v320_v61 = vrot.slane %v2671_v56, 1  ;;  %v2687_v62 = vld [vmem:[%s2528_s28 + $0xc8] sm:$0xff] }
  0x27   : > { %4356 = vst [vmem:[#allocation10_spill] sm:$0xff] %v2656_v49  ;;  %4357 = vst [vmem:[#allocation11_spill] sm:$0xff] %v2661_v52  ;;  %v2678_v57 = vsel %vm284_vm0, %v316_v50, %v318_v51  ;;  %v323_v59 = vrot.slane %v2668_v55, 1  ;;  %v2683_v60 = vsel %vm284_vm0, %v315_v53, %v316_v50  ;;  %v2690_v63 = vld [vmem:[%s2528_s28 + $0xd0] sm:$0x3]  ;;  %v2693_v3 = vld [vmem:[%s2528_s28 + $0xc0] sm:$0xff] }
  0x28   : > { %482 = vrot.lane.b32.xlu1 %v2590_v25, %s2443_s29  ;;  %4358 = vst [vmem:[#allocation12_spill] sm:$0xff] %v2678_v57  ;;  %4359 = vst [vmem:[#allocation13_spill] sm:$0xff] %v2683_v60  ;;  %v326_v6 = vrot.slane %v2687_v62, 1  ;;  %v328_v8 = vrot.slane %v2690_v63, 1  ;;  %v2705_v9 = vsel %vm284_vm0, %v320_v61, %v321_v58  ;;  %v325_v13 = vrot.slane %v2693_v3, 1  ;;  %v2709_v16 = vld [vmem:[%s2528_s28 + $0xe0] sm:$0xff] }
  0x29   : > { %480 = vrot.lane.b32.xlu0 %v2595_v28, %s2443_s29  ;;  %4360 = vst [vmem:[#allocation14_spill] sm:$0xff] %v2687_v62  ;;  %v2700_v4 = vsel %vm284_vm0, %v321_v58, %v323_v59  ;;  %4362 = vst [vmem:[#allocation16_spill] sm:$0xff] %v2705_v9  ;;  %v2712_v18 = vld [vmem:[%s2528_s28 + $0xe8] sm:$0x3]  ;;  %v2715_v19 = vld [vmem:[%s2528_s28 + $0xd8] sm:$0xff]  ;;  %v331_v21 = vrot.slane %v2709_v16, 1 }
  0x2a   : > { %4361 = vst [vmem:[#allocation15_spill] sm:$0xff] %v2700_v4  ;;  %4363 = vst [vmem:[#allocation17_spill] sm:$0xff] %v2709_v16  ;;  %v2722_v20 = vsel %vm284_vm0, %v326_v6, %v328_v8  ;;  %v333_v26 = vrot.slane %v2712_v18, 1  ;;  %v2727_v27 = vsel %vm284_vm0, %v325_v13, %v326_v6  ;;  %v330_v29 = vrot.slane %v2715_v19, 1  ;;  %v2731_v34 = vld [vmem:[%s2528_s28 + $0xf8] sm:$0xff]  ;;  %v2737_v37 = vld [vmem:[%s2528_s28 + $0xf0] sm:$0xff] }
  0x2b   : > { %4364 = vst [vmem:[#allocation18_spill] sm:$0xff] %v2722_v20  ;;  %4365 = vst [vmem:[#allocation19_spill] sm:$0xff] %v2727_v27  ;;  %v2734_v35 = vld [vmem:[%s2528_s28 + $0x100] sm:$0x3]  ;;  %v336_v43 = vrot.slane %v2731_v34, 1  ;;  %v335_v51 = vrot.slane %v2737_v37, 1 }
  0x2c   : > { %486 = vrot.lane.b32.xlu1 %v2612_v33, %s2443_s29  ;;  %4366 = vst [vmem:[#allocation20_spill] sm:$0xff] %v2731_v34  ;;  %v2744_v42 = vsel %vm284_vm0, %v331_v21, %v333_v26  ;;  %v338_v45 = vrot.slane %v2734_v35, 1  ;;  %v2749_v50 = vsel %vm284_vm0, %v330_v29, %v331_v21  ;;  %v2753_v53 = vld [vmem:[%s2528_s28 + $0x110] sm:$0xff]  ;;  %v2756_v58 = vld [vmem:[%s2528_s28 + $0x118] sm:$0x3]  ;;  %v2759_v59 = vld [vmem:[%s2528_s28 + $0x108] sm:$0xff] }
  0x2d   : > { %484 = vrot.lane.b32.xlu0 %v2617_v36, %s2443_s29  ;;  %4367 = vst [vmem:[#allocation21_spill] sm:$0xff] %v2744_v42  ;;  %4368 = vst [vmem:[#allocation22_spill] sm:$0xff] %v2749_v50  ;;  %v341_v6 = vrot.slane %v2753_v53, 1  ;;  %v343_v8 = vrot.slane %v2756_v58, 1  ;;  %v2771_v13 = vsel %vm284_vm0, %v335_v51, %v336_v43  ;;  %v340_v21 = vrot.slane %v2759_v59, 1  ;;  %v2775_v26 = vld [vmem:[%s2528_s28 + $0x128] sm:$0xff] }
  0x2e   : > { %v2766_v61 = vsel %vm284_vm0, %v336_v43, %v338_v45  ;;  %4370 = vst [vmem:[#allocation24_spill] sm:$0xff] %v2771_v13  ;;  %v2778_v29 = vld [vmem:[%s2528_s28 + $0x130] sm:$0x3]  ;;  %v346_v43 = vrot.slane %v2775_v26, 1 }
  0x2f   : > { %4369 = vst [vmem:[#allocation23_spill] sm:$0xff] %v2766_v61  ;;  %v2788_v45 = vsel %vm284_vm0, %v341_v6, %v343_v8  ;;  %v348_v51 = vrot.slane %v2778_v29, 1 }
  0x30   : > { %490 = vrot.lane.b32.xlu1 %v2634_v41, %s2443_s29  ;;  %4371 = vst [vmem:[#allocation25_spill] sm:$0xff] %v2788_v45  ;;  %v2844_v41 = vld [vmem:[%s2528_s28 + $0x178] sm:$0x3] }
  0x31   : > { %488 = vrot.lane.b32.xlu0 %v2639_v44, %s2443_s29  ;;  %v2810_v8 = vsel %vm284_vm0, %v346_v43, %v348_v51 }
  0x32   : > { %4373 = vst [vmem:[#allocation27_spill] sm:$0xff] %v2810_v8 }
  0x34   : > { %494 = vrot.lane.b32.xlu1 %v2656_v49, %s2443_s29 }
  0x35   : > { %492 = vrot.lane.b32.xlu0 %v2661_v52, %s2443_s29  ;;  %v2841_v52 = vld [vmem:[%s2528_s28 + $0x170] sm:$0xff] }
  0x38   : > { %498 = vrot.lane.b32.xlu1 %v2678_v57, %s2443_s29  ;;  %v2819_v57 = vld [vmem:[%s2528_s28 + $0x158] sm:$0xff] }
  0x39   : > { %496 = vrot.lane.b32.xlu0 %v2683_v60, %s2443_s29 }
  0x3c   : > { %502 = vrot.lane.b32.xlu1 %v2700_v4, %s2443_s29 }
  0x3d   : > { %500 = vrot.lane.b32.xlu0 %v2705_v9, %s2443_s29 }
  0x40   : > { %506 = vrot.lane.b32.xlu1 %v2722_v20, %s2443_s29 }
  0x41   : > { %504 = vrot.lane.b32.xlu0 %v2727_v27, %s2443_s29  ;;  %v2797_v27 = vld [vmem:[%s2528_s28 + $0x140] sm:$0xff] }
  0x44   : > { %510 = vrot.lane.b32.xlu1 %v2744_v42, %s2443_s29  ;;  %v2781_v42 = vld [vmem:[%s2528_s28 + $0x120] sm:$0xff] }
  0x45   : > { %508 = vrot.lane.b32.xlu0 %v2749_v50, %s2443_s29  ;;  %v2793_v50 = vsel %vm284_vm0, %v340_v21, %v341_v6  ;;  %v345_v20 = vrot.slane %v2781_v42, 1  ;;  %v351_v6 = vrot.slane %v2797_v27, 1 }
  0x46   : > { %4372 = vst [vmem:[#allocation26_spill] sm:$0xff] %v2793_v50 }
  0x47   : > { %v2815_v4 = vsel %vm284_vm0, %v345_v20, %v346_v43  ;;  %v356_v20 = vrot.slane %v2819_v57, 1 }
  0x48   : > { %514 = vrot.lane.b32.xlu1 %v2766_v61, %s2443_s29  ;;  %v2800_v61 = vld [vmem:[%s2528_s28 + $0x148] sm:$0x3]  ;;  %4374 = vst [vmem:[#allocation28_spill] sm:$0xff] %v2815_v4 }
  0x49   : > { %512 = vrot.lane.b32.xlu0 %v2771_v13, %s2443_s29  ;;  %v2803_v13 = vld [vmem:[%s2528_s28 + $0x138] sm:$0xff]  ;;  %v353_v21 = vrot.slane %v2800_v61, 1 }
  0x4a   : > { %v350_v9 = vrot.slane %v2803_v13, 1 }
  0x4b   : > { %v2832_v51 = vsel %vm284_vm0, %v351_v6, %v353_v21 }
  0x4c   : > { %518 = vrot.lane.b32.xlu1 %v2788_v45, %s2443_s29  ;;  %v2822_v45 = vld [vmem:[%s2528_s28 + $0x160] sm:$0x3]  ;;  %4375 = vst [vmem:[#allocation29_spill] sm:$0xff] %v2832_v51  ;;  %v2837_v60 = vsel %vm284_vm0, %v350_v9, %v351_v6  ;;  %v361_v9 = vrot.slane %v2841_v52, 1  ;;  %v363_v6 = vrot.slane %v2844_v41, 1 }
  0x4d   : > { %516 = vrot.lane.b32.xlu0 %v2793_v50, %s2443_s29  ;;  %v2825_v50 = vld [vmem:[%s2528_s28 + $0x150] sm:$0xff]  ;;  %v358_v43 = vrot.slane %v2822_v45, 1  ;;  %4376 = vst [vmem:[#allocation30_spill] sm:$0xff] %v2837_v60 }
  0x4e   : > { %v355_v49 = vrot.slane %v2825_v50, 1 }
  0x4f   : > { %v2854_v21 = vsel %vm284_vm0, %v356_v20, %v358_v43  ;;  %v367_v43 = vrot.slane %v2542_v5, 2  ;;  %v404_v5 = vrot.slane %v2668_v55, 2 }
  0x50   : > { %522 = vrot.lane.b32.xlu1 %v2810_v8, %s2443_s29  ;;  %v2847_v8 = vld [vmem:[%s2528_s28 + $0x168] sm:$0xff]  ;;  %4377 = vst [vmem:[#allocation31_spill] sm:$0xff] %v2854_v21 }
  0x51   : > { %520 = vrot.lane.b32.xlu0 %v2815_v4, %s2443_s29  ;;  %v2859_v4 = vsel %vm284_vm0, %v355_v49, %v356_v20  ;;  %v360_v44 = vrot.slane %v2847_v8, 1  ;;  %v366_v49 = vrot.slane %v2537_v2, 2  ;;  %v409_v2 = vrot.slane %v2690_v63, 2 }
  0x52   : > { %4378 = vst [vmem:[#allocation32_spill] sm:$0xff] %v2859_v4 }
  0x53   : > { %v2872_v33 = vsel %vm284_vm0, %v360_v44, %v361_v9  ;;  %v371_v44 = vrot.slane %v2531_v0, 2 }
  0x54   : > { %526 = vrot.lane.b32.xlu1 %v2832_v51, %s2443_s29  ;;  %v2867_v51 = vsel %vm284_vm0, %v361_v9, %v363_v6  ;;  %4380 = vst [vmem:[#allocation34_spill] sm:$0xff] %v2872_v33  ;;  %v372_v6 = vrot.slane %v2534_v1, 2 }
  0x55   : > { %524 = vrot.lane.b32.xlu0 %v2837_v60, %s2443_s29  ;;  %4379 = vst [vmem:[#allocation33_spill] sm:$0xff] %v2867_v51  ;;  %v369_v60 = vrot.slane %v2551_v10, 2  ;;  %v368_v10 = vsel %vm365_vm1, %v366_v49, %v367_v43  ;;  %v384_v49 = vrot.slane %v2581_v23, 2 }
  0x57   : > { %v370_v20 = vsel %vm365_vm1, %v367_v43, %v369_v60  ;;  %v379_v60 = vrot.slane %v2561_v14, 2 }
  0x58   : > { %530 = vrot.lane.b32.xlu1 %v2854_v21, %s2443_s29  ;;  %v374_v21 = vrot.slane %v2546_v7, 2  ;;  %v376_v7 = vrot.slane %v2564_v15, 2 }
  0x59   : > { %528 = vrot.lane.b32.xlu0 %v2859_v4, %s2443_s29  ;;  %v399_v4 = vrot.slane %v2646_v47, 2 }
  0x5a   : > { %v2887_v9 = vsel %vm365_vm1, %v372_v6, %v374_v21  ;;  %v382_v21 = vrot.slane %v2578_v22, 2 }
  0x5c   : > { %534 = vrot.lane.b32.xlu1 %v2867_v51, %s2443_s29  ;;  %v377_v51 = vrot.slane %v2554_v11, 2 }
  0x5d   : > { %532 = vrot.lane.b32.xlu0 %v2872_v33, %s2443_s29  ;;  %v2892_v33 = vsel %vm365_vm1, %v371_v44, %v372_v6  ;;  %v2913_v6 = vsel %vm365_vm1, %v382_v21, %v384_v49  ;;  %v389_v44 = vrot.slane %v2602_v31, 2  ;;  %v394_v49 = vrot.slane %v2624_v39, 2  ;;  %s2449_s29 = smov 28  }
  0x5e   : > { %v2900_v43 = vsel %vm365_vm1, %v377_v51, %v379_v60  ;;  %v2905_v14 = vsel %vm365_vm1, %v376_v7, %v377_v51  ;;  %v386_v51 = vrot.slane %v2605_v32, 2  ;;  %v392_v7 = vrot.slane %v2621_v38, 2 }
  0x60   : > { %570 = vrot.lane.b32.xlu1 %v370_v20, %s2444_s30  ;;  %v381_v20 = vrot.slane %v2584_v24, 2 }
  0x61   : > { %568 = vrot.lane.b32.xlu0 %v368_v10, %s2444_s30  ;;  %v387_v10 = vrot.slane %v2599_v30, 2 }
  0x62   : > { %v2918_v23 = vsel %vm365_vm1, %v381_v20, %v382_v21  ;;  %v391_v21 = vrot.slane %v2627_v40, 2  ;;  %v2939_v20 = vsel %vm365_vm1, %v392_v7, %v394_v49  ;;  %v402_v49 = vrot.slane %v2665_v54, 2 }
  0x63   : > { %v2926_v60 = vsel %vm365_vm1, %v387_v10, %v389_v44  ;;  %v2931_v31 = vsel %vm365_vm1, %v386_v51, %v387_v10  ;;  %v397_v44 = vrot.slane %v2643_v46, 2  ;;  %v396_v10 = vrot.slane %v2649_v48, 2 }
  0x64   : > { %574 = vrot.lane.b32.xlu1 %v2887_v9, %s2444_s30  ;;  %v2944_v39 = vsel %vm365_vm1, %v391_v21, %v392_v7  ;;  %v401_v7 = vrot.slane %v2671_v56, 2  ;;  %v2965_v21 = vsel %vm365_vm1, %v402_v49, %v404_v5  ;;  %v412_v5 = vrot.slane %v2709_v16, 2 }
  0x65   : > { %572 = vrot.lane.b32.xlu0 %v2892_v33, %s2444_s30  ;;  %v2952_v51 = vsel %vm365_vm1, %v397_v44, %v399_v4  ;;  %v2957_v47 = vsel %vm365_vm1, %v396_v10, %v397_v44  ;;  %v407_v4 = vrot.slane %v2687_v62, 2  ;;  %v406_v44 = vrot.slane %v2693_v3, 2 }
  0x66   : > { %v2970_v55 = vsel %vm365_vm1, %v401_v7, %v402_v49  ;;  %v414_v62 = vrot.slane %v2712_v18, 2  ;;  %v411_v49 = vrot.slane %v2715_v19, 2  ;;  %v419_v16 = vrot.slane %v2734_v35, 2 }
  0x67   : > { %v2978_v10 = vsel %vm365_vm1, %v407_v4, %v409_v2  ;;  %v2983_v63 = vsel %vm365_vm1, %v406_v44, %v407_v4  ;;  %v417_v2 = vrot.slane %v2731_v34, 2  ;;  %v416_v4 = vrot.slane %v2737_v37, 2 }
  0x68   : > { %578 = vrot.lane.b32.xlu1 %v2900_v43, %s2444_s30  ;;  %v2991_v7 = vsel %vm365_vm1, %v412_v5, %v414_v62  ;;  %v2996_v18 = vsel %vm365_vm1, %v411_v49, %v412_v5  ;;  %v422_v62 = vrot.slane %v2753_v53, 2  ;;  %v424_v34 = vrot.slane %v2756_v58, 2 }
  0x69   : > { %576 = vrot.lane.b32.xlu0 %v2905_v14, %s2444_s30  ;;  %v3004_v44 = vsel %vm365_vm1, %v417_v2, %v419_v16  ;;  %v3009_v35 = vsel %vm365_vm1, %v416_v4, %v417_v2  ;;  %v421_v5 = vrot.slane %v2759_v59, 2  ;;  %v427_v16 = vrot.slane %v2775_v26, 2 }
  0x6a   : > { %v3017_v49 = vsel %vm365_vm1, %v422_v62, %v424_v34  ;;  %v429_v53 = vrot.slane %v2778_v29, 2  ;;  %v426_v2 = vrot.slane %v2781_v42, 2  ;;  %v432_v34 = vrot.slane %v2797_v27, 2 }
  0x6b   : > { %v3022_v58 = vsel %vm365_vm1, %v421_v5, %v422_v62  ;;  %v434_v26 = vrot.slane %v2800_v61, 2  ;;  %v431_v62 = vrot.slane %v2803_v13, 2  ;;  %v437_v5 = vrot.slane %v2819_v57, 2 }
  0x6c   : > { %582 = vrot.lane.b32.xlu1 %v2913_v6, %s2444_s30  ;;  %v3030_v4 = vsel %vm365_vm1, %v427_v16, %v429_v53  ;;  %v3035_v29 = vsel %vm365_vm1, %v426_v2, %v427_v16  ;;  %v439_v27 = vrot.slane %v2822_v45, 2  ;;  %v436_v13 = vrot.slane %v2825_v50, 2 }
  0x6d   : > { %580 = vrot.lane.b32.xlu0 %v2918_v23, %s2444_s30  ;;  %4381 = vst [vmem:[#allocation35_spill] sm:$0xff] %v3030_v4  ;;  %4382 = vst [vmem:[#allocation36_spill] sm:$0xff] %v3035_v29  ;;  %v3043_v42 = vsel %vm365_vm1, %v432_v34, %v434_v26  ;;  %v3050_v61 = vsel %vm365_vm1, %v431_v62, %v432_v34  ;;  %v442_v57 = vrot.slane %v2841_v52, 2  ;;  %v444_v45 = vrot.slane %v2844_v41, 2 }
  0x6e   : > { %4383 = vst [vmem:[#allocation37_spill] sm:$0xff] %v3043_v42  ;;  %4384 = vst [vmem:[#allocation38_spill] sm:$0xff] %v3050_v61  ;;  %v3060_v2 = vsel %vm365_vm1, %v437_v5, %v439_v27  ;;  %v3067_v34 = vsel %vm365_vm1, %v436_v13, %v437_v5  ;;  %v441_v50 = vrot.slane %v2847_v8, 2 }
  0x6f   : > { %4385 = vst [vmem:[#allocation39_spill] sm:$0xff] %v3060_v2  ;;  %4386 = vst [vmem:[#allocation40_spill] sm:$0xff] %v3067_v34  ;;  %v3077_v27 = vsel %vm365_vm1, %v442_v57, %v444_v45 }
  0x70   : > { %586 = vrot.lane.b32.xlu1 %v2926_v60, %s2444_s30  ;;  %4387 = vst [vmem:[#allocation41_spill] sm:$0xff] %v3077_v27  ;;  %v3082_v41 = vsel %vm365_vm1, %v441_v50, %v442_v57 }
  0x71   : > { %584 = vrot.lane.b32.xlu0 %v2931_v31, %s2444_s30  ;;  %4388 = vst [vmem:[#allocation42_spill] sm:$0xff] %v3082_v41 }
  0x74   : > { %590 = vrot.lane.b32.xlu1 %v2939_v20, %s2444_s30 }
  0x75   : > { %588 = vrot.lane.b32.xlu0 %v2944_v39, %s2444_s30 }
  0x78   : > { %594 = vrot.lane.b32.xlu1 %v2952_v51, %s2444_s30 }
  0x79   : > { %592 = vrot.lane.b32.xlu0 %v2957_v47, %s2444_s30 }
  0x7c   : > { %598 = vrot.lane.b32.xlu1 %v2965_v21, %s2444_s30 }
  0x7d   : > { %596 = vrot.lane.b32.xlu0 %v2970_v55, %s2444_s30 }
  0x80   : > { %602 = vrot.lane.b32.xlu1 %v2978_v10, %s2444_s30 }
  0x81   : > { %600 = vrot.lane.b32.xlu0 %v2983_v63, %s2444_s30 }
  0x84   : > { %606 = vrot.lane.b32.xlu1 %v2991_v7, %s2444_s30 }
  0x85   : > { %604 = vrot.lane.b32.xlu0 %v2996_v18, %s2444_s30 }
  0x88   : > { %610 = vrot.lane.b32.xlu1 %v3004_v44, %s2444_s30 }
  0x89   : > { %608 = vrot.lane.b32.xlu0 %v3009_v35, %s2444_s30 }
  0x8c   : > { %614 = vrot.lane.b32.xlu1 %v3017_v49, %s2444_s30 }
  0x8d   : > { %612 = vrot.lane.b32.xlu0 %v3022_v58, %s2444_s30 }
  0x90   : > { %618 = vrot.lane.b32.xlu1 %v3030_v4, %s2444_s30 }
  0x91   : > { %616 = vrot.lane.b32.xlu0 %v3035_v29, %s2444_s30  ;;  %v4442_v29 = vld [vmem:[#allocation6_spill] sm:$0xff] }
  0x92   : > { %v3047_v53 = vpop.permute.xlu1 %476 }
  0x93   : > { %v3053_v16 = vpop.permute.xlu0 %472 }
  0x94   : > { %622 = vrot.lane.b32.xlu1 %v3043_v42, %s2444_s30 }
  0x95   : > { %620 = vrot.lane.b32.xlu0 %v3050_v61, %s2444_s30 }
  0x96   : > { %v3064_v26 = vpop.permute.xlu1 %478 }
  0x97   : > { %v3070_v62 = vpop.permute.xlu0 %474 }
  0x98   : > { %626 = vrot.lane.b32.xlu1 %v3060_v2, %s2444_s30 }
  0x99   : > { %624 = vrot.lane.b32.xlu0 %v3067_v34, %s2444_s30 }
  0x9a   : > { %v3079_v52 = vpop.permute.xlu1 %482 }
  0x9b   : > { %v3084_v5 = vpop.permute.xlu0 %480 }
  0x9c   : > { %630 = vrot.lane.b32.xlu1 %v3077_v27, %s2444_s30 }
  0x9d   : > { %628 = vrot.lane.b32.xlu0 %v3082_v41, %s2444_s30  ;;  %s2450_s30 = smov 32  }
  0x9e   : > { %v3090_v8 = vpop.permute.xlu1 %486 }
  0x9f   : > { %v3092_v13 = vpop.permute.xlu0 %484 }
  0xa0   : > { %666 = vrot.lane.b32.xlu1 %v2534_v1, %s2445_s4 }
  0xa1   : > { %664 = vrot.lane.b32.xlu0 %v2531_v0, %s2445_s4 }
  0xa2   : > { %v3098_v57 = vpop.permute.xlu1 %490 }
  0xa3   : > { %v3100_v45 = vpop.permute.xlu0 %488 }
  0xa4   : > { %670 = vrot.lane.b32.xlu1 %v2554_v11, %s2445_s4 }
  0xa5   : > { %668 = vrot.lane.b32.xlu0 %v2564_v15, %s2445_s4 }
  0xa6   : > { %v3106_v50 = vpop.permute.xlu1 %494 }
  0xa7   : > { %v3108_v27 = vpop.permute.xlu0 %492 }
  0xa8   : > { %674 = vrot.lane.b32.xlu1 %v2578_v22, %s2445_s4 }
  0xa9   : > { %672 = vrot.lane.b32.xlu0 %v2584_v24, %s2445_s4 }
  0xaa   : > { %v3114_v1 = vpop.permute.xlu1 %498 }
  0xab   : > { %4389 = vst [vmem:[#allocation43_spill] sm:$0xff] %v3114_v1  ;;  %v3116_v41 = vpop.permute.xlu0 %496 }
  0xac   : > { %4390 = vst [vmem:[#allocation44_spill] sm:$0xff] %v3116_v41  ;;  %678 = vrot.lane.b32.xlu1 %v2599_v30, %s2445_s4 }
  0xad   : > { %676 = vrot.lane.b32.xlu0 %v2605_v32, %s2445_s4 }
  0xae   : > { %v3122_v2 = vpop.permute.xlu1 %502 }
  0xaf   : > { %4391 = vst [vmem:[#allocation45_spill] sm:$0xff] %v3122_v2  ;;  %v3124_v34 = vpop.permute.xlu0 %500 }
  0xb0   : > { %4392 = vst [vmem:[#allocation46_spill] sm:$0xff] %v3124_v34  ;;  %682 = vrot.lane.b32.xlu1 %v2621_v38, %s2445_s4 }
  0xb1   : > { %680 = vrot.lane.b32.xlu0 %v2627_v40, %s2445_s4 }
  0xb2   : > { %v3130_v42 = vpop.permute.xlu1 %506 }
  0xb3   : > { %4393 = vst [vmem:[#allocation47_spill] sm:$0xff] %v3130_v42  ;;  %v3132_v61 = vpop.permute.xlu0 %504  ;;  %v1504_v42 = vld [vmem:[%s4272_s1] sm:$0xff] }
  0xb4   : > { %4394 = vst [vmem:[#allocation48_spill] sm:$0xff] %v3132_v61  ;;  %686 = vrot.lane.b32.xlu1 %v2643_v46, %s2445_s4  ;;  %v1505_v61 = vld [vmem:[%s4272_s1 + $0x8] sm:$0xff] }
  0xb5   : > { %684 = vrot.lane.b32.xlu0 %v2649_v48, %s2445_s4  ;;  %v2288_v34 = vpack.c.bf16 %v1505_v61, %v1504_v42 }
  0xb6   : > { %v3138_v1 = vpop.permute.xlu1 %510 }
  0xb7   : > { %4395 = vst [vmem:[#allocation49_spill] sm:$0xff] %v3138_v1  ;;  %v3140_v2 = vpop.permute.xlu0 %508  ;;  %2289 = vmatprep.subr.bf16.mxu0 %v2288_v34  ;;  %2296 = vmatprep.subr.bf16.mxu1 %v2288_v34 }
  0xb8   : > { %4396 = vst [vmem:[#allocation50_spill] sm:$0xff] %v3140_v2  ;;  %760 = vrot.lane.b32.xlu1 %v2557_v12, %s2446_s5  ;;  %2291 = vmatpush3.bf16.msra.mxu0 %v2288_v34  ;;  %v1506_v12 = vld [vmem:[%s4272_s1 + $0x10] sm:$0xff]  ;;  %v1507_v2 = vld [vmem:[%s4272_s1 + $0x18] sm:$0xff] }
  0xb9   : > { %688 = vrot.lane.b32.xlu0 %v2671_v56, %s2445_s4  ;;  %v2292_v42 = vpack.c.bf16 %v1507_v2, %v1506_v12  ;;  %2299 = vmatpush3.bf16.msra.mxu1 %v2288_v34 }
  0xba   : > { %v3152_v41 = vpop.permute.xlu1 %514 }
  0xbb   : > { %4397 = vst [vmem:[#allocation51_spill] sm:$0xff] %v3152_v41  ;;  %v3154_v1 = vpop.permute.xlu0 %512  ;;  %2293 = vmatprep.subr.bf16.mxu0 %v2292_v42  ;;  %2297 = vmatprep.subr.bf16.mxu1 %v2292_v42 }
  0xbc   : > { %4398 = vst [vmem:[#allocation52_spill] sm:$0xff] %v3154_v1  ;;  %856 = vrot.lane.b32.xlu1 %v2892_v33, %s2447_s10  ;;  %2295 = vmatpush3.bf16.msra.mxu0 %v2292_v42 }
  0xbd   : > { %762 = vrot.lane.b32.xlu0 %v2571_v17, %s2446_s5  ;;  %v1508_v17 = vld [vmem:[%s4272_s1 + $0x20] sm:$0xf]  ;;  %2300 = vmatpush3.bf16.msra.mxu1 %v2292_v42 }
  0xbe   : > { %v3166_v61 = vpop.permute.xlu1 %518  ;;  %2238 = vmatprep.subr.msk.mxu0 %vm1606_vm2, %v1508_v17  ;;  %2298 = vmatprep.subr.msk.mxu1 %vm1606_vm2, %v1508_v17 }
  0xbf   : > { %4399 = vst [vmem:[#allocation53_spill] sm:$0xff] %v3166_v61  ;;  %v3168_v41 = vpop.permute.xlu0 %516  ;;  %v4416_v61 = vld [vmem:[#allocation8_spill] sm:$0xff] }
  0xc0   : > { %4400 = vst [vmem:[#allocation54_spill] sm:$0xff] %v3168_v41  ;;  %952 = vrot.lane.b32.xlu1 %v2564_v15, %s2448_s25  ;;  %2239 = vmatpush3.msk.msra.mxu0 %vm1606_vm2, %v1508_v17 }
  0xc1   : > { %858 = vrot.lane.b32.xlu0 %v2887_v9, %s2447_s10  ;;  %2301 = vmatpush3.msk.msra.mxu1 %vm1606_vm2, %v1508_v17 }
  0xc2   : > { %v3177_v33 = vpop.permute.xlu1 %522 }
  0xc3   : > { %4401 = vst [vmem:[#allocation55_spill] sm:$0xff] %v3177_v33  ;;  %v3179_v2 = vpop.permute.xlu0 %520  ;;  %v4413_v33 = vld [vmem:[#allocation9_spill] sm:$0xff] }
  0xc4   : > { %4402 = vst [vmem:[#allocation56_spill] sm:$0xff] %v3179_v2  ;;  %1048 = vrot.lane.b32.xlu1 %v2595_v28, %s2449_s29 }
  0xc5   : > { %954 = vrot.lane.b32.xlu0 %v2554_v11, %s2448_s25 }
  0xc6   : > { %v3185_v15 = vpop.permute.xlu1 %526 }
  0xc7   : > { %4403 = vst [vmem:[#allocation57_spill] sm:$0xff] %v3185_v15  ;;  %v3187_v9 = vpop.permute.xlu0 %524 }
  0xc8   : > { %4404 = vst [vmem:[#allocation58_spill] sm:$0xff] %v3187_v9  ;;  %1050 = vrot.lane.b32.xlu1 %v2590_v25, %s2449_s29 }
  0xc9   : > { %764 = vrot.lane.b32.xlu0 %v2595_v28, %s2446_s5 }
  0xca   : > { %v3193_v34 = vpop.permute.xlu1 %530 }
  0xcb   : > { %4405 = vst [vmem:[#allocation59_spill] sm:$0xff] %v3193_v34  ;;  %v3195_v12 = vpop.permute.xlu0 %528  ;;  %v4409_v34 = vld [vmem:[#allocation7_spill] sm:$0xff] }
  0xcc   : > { %4406 = vst [vmem:[#allocation60_spill] sm:$0xff] %v3195_v12  ;;  %766 = vrot.lane.b32.xlu1 %v2590_v25, %s2446_s5 }
  0xcd   : > { %1144 = vrot.lane.b32.xlu0 %v2905_v14, %s2450_s30 }
  0xce   : > { %v3201_v11 = vpop.permute.xlu1 %534 }
  0xcf   : > { %4407 = vst [vmem:[#allocation61_spill] sm:$0xff] %v3201_v11  ;;  %v3203_v42 = vpop.permute.xlu0 %532 }
  0xd0   : > { %4408 = vst [vmem:[#allocation62_spill] sm:$0xff] %v3203_v42  ;;  %1146 = vrot.lane.b32.xlu1 %v2900_v43, %s2450_s30 }
  0xd1   : > { %860 = vrot.lane.b32.xlu0 %v2905_v14, %s2447_s10 }
  0xd2   : > { %v3209_v28 = vpop.permute.xlu1 %570 }
  0xd3   : > { %v3211_v17 = vpop.permute.xlu0 %568 }
  0xd4   : > { %956 = vrot.lane.b32.xlu1 %v2584_v24, %s2448_s25 }
  0xd5   : > { %862 = vrot.lane.b32.xlu0 %v2900_v43, %s2447_s10 }
  0xd6   : > { %v3217_v25 = vpop.permute.xlu1 %574 }
  0xd7   : > { %v3219_v11 = vpop.permute.xlu0 %572 }
  0xd8   : > { %1052 = vrot.lane.b32.xlu1 %v2617_v36, %s2449_s29 }
  0xd9   : > { %958 = vrot.lane.b32.xlu0 %v2578_v22, %s2448_s25 }
  0xda   : > { %v3225_v14 = vpop.permute.xlu1 %578 }
  0xdb   : > { %v3227_v42 = vpop.permute.xlu0 %576 }
  0xdc   : > { %1054 = vrot.lane.b32.xlu1 %v4409_v34, %s2449_s29 }
  0xdd   : > { %768 = vrot.lane.b32.xlu0 %v2617_v36, %s2446_s5 }
  0xde   : > { %v3233_v24 = vpop.permute.xlu1 %582 }
  0xdf   : > { %v3235_v43 = vpop.permute.xlu0 %580 }
  0xe0   : > { %770 = vrot.lane.b32.xlu1 %v4409_v34, %s2446_s5 }
  0xe1   : > { %1148 = vrot.lane.b32.xlu0 %v2918_v23, %s2450_s30 }
  0xe2   : > { %v3241_v22 = vpop.permute.xlu1 %586 }
  0xe3   : > { %v3243_v12 = vpop.permute.xlu0 %584 }
  0xe4   : > { %1150 = vrot.lane.b32.xlu1 %v2913_v6, %s2450_s30 }
  0xe5   : > { %864 = vrot.lane.b32.xlu0 %v2918_v23, %s2447_s10 }
  0xe6   : > { %v3249_v36 = vpop.permute.xlu1 %590 }
  0xe7   : > { %4410 = vst [vmem:[#allocation7_spill] sm:$0xff] %v3249_v36  ;;  %v3251_v15 = vpop.permute.xlu0 %588 }
  0xe8   : > { %960 = vrot.lane.b32.xlu1 %v2605_v32, %s2448_s25 }
  0xe9   : > { %866 = vrot.lane.b32.xlu0 %v2913_v6, %s2447_s10 }
  0xea   : > { %v3257_v34 = vpop.permute.xlu1 %594 }
  0xeb   : > { %4411 = vst [vmem:[#allocation63_spill] sm:$0xff] %v3257_v34  ;;  %v3259_v9 = vpop.permute.xlu0 %592  ;;  %v4441_v34 = vld [vmem:[#allocation5_spill] sm:$0xff] }
  0xec   : > { %4412 = vst [vmem:[#allocation64_spill] sm:$0xff] %v3259_v9  ;;  %1056 = vrot.lane.b32.xlu1 %v4413_v33, %s2449_s29 }
  0xed   : > { %962 = vrot.lane.b32.xlu0 %v2599_v30, %s2448_s25 }
  0xee   : > { %v3265_v23 = vpop.permute.xlu1 %598 }
  0xef   : > { %4414 = vst [vmem:[#allocation9_spill] sm:$0xff] %v3265_v23  ;;  %v3267_v2 = vpop.permute.xlu0 %596 }
  0xf0   : > { %4415 = vst [vmem:[#allocation65_spill] sm:$0xff] %v3267_v2  ;;  %1058 = vrot.lane.b32.xlu1 %v4416_v61, %s2449_s29 }
  0xf1   : > { %772 = vrot.lane.b32.xlu0 %v4413_v33, %s2446_s5 }
  0xf2   : > { %v3273_v32 = vpop.permute.xlu1 %602 }
  0xf3   : > { %4417 = vst [vmem:[#allocation8_spill] sm:$0xff] %v3273_v32  ;;  %v3275_v6 = vpop.permute.xlu0 %600 }
  0xf4   : > { %4418 = vst [vmem:[#allocation66_spill] sm:$0xff] %v3275_v6  ;;  %774 = vrot.lane.b32.xlu1 %v4416_v61, %s2446_s5  ;;  %v4440_v6 = vld [vmem:[#allocation15_spill] sm:$0xff] }
  0xf5   : > { %1152 = vrot.lane.b32.xlu0 %v2931_v31, %s2450_s30 }
  0xf6   : > { %v3281_v30 = vpop.permute.xlu1 %606 }
  0xf7   : > { %4419 = vst [vmem:[#allocation67_spill] sm:$0xff] %v3281_v30  ;;  %v3283_v41 = vpop.permute.xlu0 %604 }
  0xf8   : > { %4420 = vst [vmem:[#allocation68_spill] sm:$0xff] %v3283_v41  ;;  %1154 = vrot.lane.b32.xlu1 %v2926_v60, %s2450_s30  ;;  %v4425_v41 = vld [vmem:[#allocation11_spill] sm:$0xff] }
  0xf9   : > { %868 = vrot.lane.b32.xlu0 %v2931_v31, %s2447_s10 }
  0xfa   : > { %v3289_v33 = vpop.permute.xlu1 %610 }
  0xfb   : > { %4421 = vst [vmem:[#allocation69_spill] sm:$0xff] %v3289_v33  ;;  %v3291_v1 = vpop.permute.xlu0 %608 }
  0xfc   : > { %4422 = vst [vmem:[#allocation70_spill] sm:$0xff] %v3291_v1  ;;  %964 = vrot.lane.b32.xlu1 %v2627_v40, %s2448_s25  ;;  %v4428_v1 = vld [vmem:[#allocation10_spill] sm:$0xff] }
  0xfd   : > { %870 = vrot.lane.b32.xlu0 %v2926_v60, %s2447_s10 }
  0xfe   : > { %v3297_v61 = vpop.permute.xlu1 %614 }
  0xff   : > { %4423 = vst [vmem:[#allocation71_spill] sm:$0xff] %v3297_v61  ;;  %v3299_v30 = vpop.permute.xlu0 %612 }
 0x100   : > { %4424 = vst [vmem:[#allocation72_spill] sm:$0xff] %v3299_v30  ;;  %1060 = vrot.lane.b32.xlu1 %v4425_v41, %s2449_s29  ;;  %v4438_v30 = vld [vmem:[#allocation16_spill] sm:$0xff] }
 0x101   : > { %966 = vrot.lane.b32.xlu0 %v2621_v38, %s2448_s25 }
 0x102   : > { %v3305_v31 = vpop.permute.xlu1 %618 }
 0x103   : > { %4426 = vst [vmem:[#allocation11_spill] sm:$0xff] %v3305_v31  ;;  %v3307_v33 = vpop.permute.xlu0 %616 }
 0x104   : > { %4427 = vst [vmem:[#allocation73_spill] sm:$0xff] %v3307_v33  ;;  %1062 = vrot.lane.b32.xlu1 %v4428_v1, %s2449_s29 }
 0x105   : > { %776 = vrot.lane.b32.xlu0 %v4425_v41, %s2446_s5 }
 0x106   : > { %v3313_v40 = vpop.permute.xlu1 %622 }
 0x107   : > { %4429 = vst [vmem:[#allocation10_spill] sm:$0xff] %v3313_v40  ;;  %v3315_v60 = vpop.permute.xlu0 %620 }
 0x108   : > { %4430 = vst [vmem:[#allocation74_spill] sm:$0xff] %v3315_v60  ;;  %778 = vrot.lane.b32.xlu1 %v4428_v1, %s2446_s5 }
 0x109   : > { %1156 = vrot.lane.b32.xlu0 %v2944_v39, %s2450_s30 }
 0x10a   : > { %v3321_v38 = vpop.permute.xlu1 %626 }
 0x10b   : > { %4431 = vst [vmem:[#allocation75_spill] sm:$0xff] %v3321_v38  ;;  %v3323_v31 = vpop.permute.xlu0 %624 }
 0x10c   : > { %4432 = vst [vmem:[#allocation76_spill] sm:$0xff] %v3323_v31  ;;  %1158 = vrot.lane.b32.xlu1 %v2939_v20, %s2450_s30  ;;  %v4435_v31 = vld [vmem:[#allocation13_spill] sm:$0xff] }
 0x10d   : > { %872 = vrot.lane.b32.xlu0 %v2944_v39, %s2447_s10 }
 0x10e   : > { %v3329_v41 = vpop.permute.xlu1 %630 }
 0x10f   : > { %4433 = vst [vmem:[#allocation77_spill] sm:$0xff] %v3329_v41  ;;  %v3331_v40 = vpop.permute.xlu0 %628 }
 0x110   : > { %4434 = vst [vmem:[#allocation78_spill] sm:$0xff] %v3331_v40  ;;  %968 = vrot.lane.b32.xlu1 %v2649_v48, %s2448_s25  ;;  %v4436_v40 = vld [vmem:[#allocation12_spill] sm:$0xff] }
 0x111   : > { %874 = vrot.lane.b32.xlu0 %v2939_v20, %s2447_s10 }
 0x112   : > { %v667_v1 = vpop.permute.xlu1 %666 }
 0x113   : > { %v665_v38 = vpop.permute.xlu0 %664 }
 0x114   : > { %1064 = vrot.lane.b32.xlu1 %v4435_v31, %s2449_s29 }
 0x115   : > { %970 = vrot.lane.b32.xlu0 %v2643_v46, %s2448_s25 }
 0x116   : > { %v3341_v60 = vpop.permute.xlu1 %670 }
 0x117   : > { %v3343_v39 = vpop.permute.xlu0 %668 }
 0x118   : > { %1066 = vrot.lane.b32.xlu1 %v4436_v40, %s2449_s29 }
 0x119   : > { %780 = vrot.lane.b32.xlu0 %v4435_v31, %s2446_s5 }
 0x11a   : > { %v3349_v48 = vpop.permute.xlu1 %674 }
 0x11b   : > { %v3351_v20 = vpop.permute.xlu0 %672 }
 0x11c   : > { %782 = vrot.lane.b32.xlu1 %v4436_v40, %s2446_s5 }
 0x11d   : > { %1160 = vrot.lane.b32.xlu0 %v2957_v47, %s2450_s30 }
 0x11e   : > { %v3357_v46 = vpop.permute.xlu1 %678 }
 0x11f   : > { %v3359_v41 = vpop.permute.xlu0 %676 }
 0x120   : > { %1162 = vrot.lane.b32.xlu1 %v2952_v51, %s2450_s30 }
 0x121   : > { %876 = vrot.lane.b32.xlu0 %v2957_v47, %s2447_s10 }
 0x122   : > { %v3365_v31 = vpop.permute.xlu1 %682 }
 0x123   : > { %v3367_v33 = vpop.permute.xlu0 %680 }
 0x124   : > { %972 = vrot.lane.b32.xlu1 %v2671_v56, %s2448_s25 }
 0x125   : > { %878 = vrot.lane.b32.xlu0 %v2952_v51, %s2447_s10 }
 0x126   : > { %v3373_v40 = vpop.permute.xlu1 %686 }
 0x127   : > { %4437 = vst [vmem:[#allocation13_spill] sm:$0xff] %v3373_v40  ;;  %v3375_v61 = vpop.permute.xlu0 %684  ;;  %v1242_v40 = vsel %vm1240_vm3, %v4442_v29, %v3070_v62 }
 0x128   : > { %1068 = vrot.lane.b32.xlu1 %v4438_v30, %s2449_s29 }
 0x129   : > { %974 = vrot.lane.b32.xlu0 %v2665_v54, %s2448_s25 }
 0x12a   : > { %v761_v47 = vpop.permute.xlu1 %760 }
 0x12b   : > { %v3381_v32 = vpop.permute.xlu0 %688 }
 0x12c   : > { %4439 = vst [vmem:[#allocation12_spill] sm:$0xff] %v3381_v32  ;;  %784 = vrot.lane.b32.xlu1 %v4438_v30, %s2446_s5  ;;  %v1241_v32 = vsel %vm1240_vm3, %v4441_v34, %v3053_v16 }
 0x12d   : > { %690 = vrot.lane.b32.xlu0 %v2665_v54, %s2445_s4 }
 0x12e   : > { %v857_v56 = vpop.permute.xlu1 %856 }
 0x12f   : > { %v763_v51 = vpop.permute.xlu0 %762 }
 0x130   : > { %1164 = vrot.lane.b32.xlu1 %v2970_v55, %s2450_s30 }
 0x131   : > { %1070 = vrot.lane.b32.xlu0 %v4440_v6, %s2449_s29 }
 0x132   : > { %v953_v23 = vpop.permute.xlu1 %952 }
 0x133   : > { %v859_v2 = vpop.permute.xlu0 %858 }
 0x134   : > { %880 = vrot.lane.b32.xlu1 %v2970_v55, %s2447_s10  ;;  %v1274_v55 = vsel %vm1273_vm4, %v1241_v32, %v3211_v17 }
 0x135   : > { %786 = vrot.lane.b32.xlu0 %v4440_v6, %s2446_s5  ;;  %v1307_v9 = vsel %vm1306_vm5, %v1274_v55, %v665_v38 }
 0x136   : > { %v1049_v30 = vpop.permute.xlu1 %1048  ;;  %v1340_v36 = vsel %vm1339_vm6, %v1307_v9, %v761_v47 }
 0x137   : > { %v955_v54 = vpop.permute.xlu0 %954  ;;  %v1373_v16 = vsel %vm1372_vm7, %v1340_v36, %v857_v56 }
 0x138   : > { %882 = vrot.lane.b32.xlu1 %v2965_v21, %s2447_s10  ;;  %v1406_v34 = vsel %vm1405_vm8, %v1373_v16, %v953_v23 }
 0x139   : > { %1166 = vrot.lane.b32.xlu0 %v2965_v21, %s2450_s30  ;;  %v1275_v21 = vsel %vm1273_vm4, %v1242_v40, %v3209_v28  ;;  %v1439_v9 = vsel %vm1438_vm9, %v1406_v34, %v1049_v30  ;;  %v4443_v28 = vld [vmem:[#allocation19_spill] sm:$0xff]  ;;  %v4445_v30 = vld [vmem:[#allocation18_spill] sm:$0xff] }
 0x13a   : > { %v1051_v6 = vpop.permute.xlu1 %1050  ;;  %v1308_v17 = vsel %vm1306_vm5, %v1275_v21, %v667_v1  ;;  %v4444_v1 = vld [vmem:[#allocation14_spill] sm:$0xff] }
 0x13b   : > { %v765_v4 = vpop.permute.xlu0 %764  ;;  %v1341_v62 = vsel %vm1339_vm6, %v1308_v17, %v763_v51 }
 0x13c   : > { %692 = vrot.lane.b32.xlu1 %v2693_v3, %s2445_s4  ;;  %v1374_v38 = vsel %vm1372_vm7, %v1341_v62, %v859_v2  ;;  %v2350_v62 = vld [vmem:[%s2528_s28 + $0x20] sm:$0xff] }
 0x13d   : > { %976 = vrot.lane.b32.xlu0 %v2693_v3, %s2448_s25  ;;  %v1407_v3 = vsel %vm1405_vm8, %v1374_v38, %v955_v54 }
 0x13e   : > { %v767_v29 = vpop.permute.xlu1 %766  ;;  %v1440_v23 = vsel %vm1438_vm9, %v1407_v3, %v1051_v6  ;;  %v1243_v6 = vsel %vm1240_vm3, %v2531_v0, %v3047_v53 }
 0x13f   : > { %v1145_v32 = vpop.permute.xlu0 %1144  ;;  %v1276_v21 = vsel %vm1273_vm4, %v1243_v6, %v3219_v11 }
 0x140   : > { %1072 = vrot.lane.b32.xlu1 %v4443_v28, %s2449_s29  ;;  %v1472_v36 = vsel %vm1471_vm10, %v1439_v9, %v1145_v32  ;;  %v1309_v17 = vsel %vm1306_vm5, %v1276_v21, %v3343_v39  ;;  %v1244_v9 = vsel %vm1240_vm3, %v2350_v62, %v3064_v26 }
 0x141   : > { %978 = vrot.lane.b32.xlu0 %v4444_v1, %s2448_s25  ;;  %2240 = vmatprep.mubr.msk.f32.mxu0 %vm1509_vm11, %v1472_v36  ;;  %v1277_v0 = vsel %vm1273_vm4, %v1244_v9, %v3217_v25 }
 0x142   : > { %v1147_v40 = vpop.permute.xlu1 %1146  ;;  %v1310_v11 = vsel %vm1306_vm5, %v1277_v0, %v3341_v60 }
 0x143   : > { %v1473_v47 = vsel %vm1471_vm10, %v1440_v23, %v1147_v40  ;;  %v861_v56 = vpop.permute.xlu0 %860  ;;  %v1343_v26 = vsel %vm1339_vm6, %v1310_v11, %v767_v29  ;;  %v4447_v23 = vld [vmem:[#allocation17_spill] sm:$0xff] }
 0x144   : > { %788 = vrot.lane.b32.xlu1 %v4443_v28, %s2446_s5  ;;  %2241 = vmatmul.mubr.msk.f32.vlgmr.msra.gmra.mrb[0].mxu0 %vm1509_vm11, %v1473_v47 }
 0x145   : > { %694 = vrot.lane.b32.xlu0 %v4444_v1, %s2445_s4  ;;  %v4446_v1 = vld [vmem:[#allocation22_spill] sm:$0xff] }
 0x146   : > { %v957_v2 = vpop.permute.xlu1 %956 }
 0x147   : > { %v863_v51 = vpop.permute.xlu0 %862 }
 0x148   : > { %1168 = vrot.lane.b32.xlu1 %v2983_v63, %s2450_s30  ;;  %v1376_v28 = vsel %vm1372_vm7, %v1343_v26, %v863_v51 }
 0x149   : > { %1074 = vrot.lane.b32.xlu0 %v4445_v30, %s2449_s29 }
 0x14a   : > { %v1053_v54 = vpop.permute.xlu1 %1052 }
 0x14b   : > { %v959_v55 = vpop.permute.xlu0 %958 }
 0x14c   : > { %884 = vrot.lane.b32.xlu1 %v2983_v63, %s2447_s10  ;;  %v1342_v63 = vsel %vm1339_vm6, %v1309_v17, %v765_v4 }
 0x14d   : > { %790 = vrot.lane.b32.xlu0 %v4445_v30, %s2446_s5  ;;  %v1375_v53 = vsel %vm1372_vm7, %v1342_v63, %v861_v56  ;;  %v4448_v30 = vld [vmem:[#allocation21_spill] sm:$0xff] }
 0x14e   : > { %v1055_v16 = vpop.permute.xlu1 %1054  ;;  %v1408_v39 = vsel %vm1405_vm8, %v1375_v53, %v957_v2  ;;  %v2351_v2 = vld [vmem:[%s2528_s28 + $0x30] sm:$0xff] }
 0x14f   : > { %v769_v34 = vpop.permute.xlu0 %768  ;;  %v1441_v4 = vsel %vm1438_vm9, %v1408_v39, %v1053_v54  ;;  %v1245_v51 = vsel %vm1240_vm3, %v2351_v2, %v3084_v5 }
 0x150   : > { %886 = vrot.lane.b32.xlu1 %v2978_v10, %s2447_s10  ;;  %v1278_v54 = vsel %vm1273_vm4, %v1245_v51, %v3227_v42 }
 0x151   : > { %1170 = vrot.lane.b32.xlu0 %v2978_v10, %s2450_s30  ;;  %v1409_v10 = vsel %vm1405_vm8, %v1376_v28, %v959_v55  ;;  %v1311_v6 = vsel %vm1306_vm5, %v1278_v54, %v3351_v20 }
 0x152   : > { %v771_v32 = vpop.permute.xlu1 %770  ;;  %v1442_v60 = vsel %vm1438_vm9, %v1409_v10, %v1055_v16  ;;  %v2352_v16 = vld [vmem:[%s2528_s28 + $0x38] sm:$0xff]  ;;  %v1344_v62 = vsel %vm1339_vm6, %v1311_v6, %v769_v34  ;;  %v2353_v10 = vld [vmem:[%s2528_s28 + $0x48] sm:$0xff] }
 0x153   : > { %v1149_v38 = vpop.permute.xlu0 %1148  ;;  %v1246_v17 = vsel %vm1240_vm3, %v2352_v16, %v3079_v52 }
 0x154   : > { %v1474_v25 = vsel %vm1471_vm10, %v1441_v4, %v1149_v38  ;;  %696 = vrot.lane.b32.xlu1 %v2715_v19, %s2445_s4  ;;  %v1279_v5 = vsel %vm1273_vm4, %v1246_v17, %v3225_v14  ;;  %v4449_v4 = vld [vmem:[#allocation24_spill] sm:$0xff]  ;;  %v3576_v17 = vld [vmem:[%s2528_s28 + $0x108] sm:$0xff] }
 0x155   : > { %980 = vrot.lane.b32.xlu0 %v2715_v19, %s2448_s25  ;;  %2243 = vmatprep.mubr.msk.f32.mxu0 %vm1509_vm11, %v1474_v25  ;;  %v1312_v42 = vsel %vm1306_vm5, %v1279_v5, %v3349_v48  ;;  %v4450_v38 = vld [vmem:[#allocation20_spill] sm:$0xff] }
 0x156   : > { %v1151_v29 = vpop.permute.xlu1 %1150  ;;  %v1345_v52 = vsel %vm1339_vm6, %v1312_v42, %v771_v32  ;;  %v2356_v42 = vld [vmem:[%s2528_s28 + $0x60] sm:$0xff] }
 0x157   : > { %v1475_v36 = vsel %vm1471_vm10, %v1442_v60, %v1151_v29  ;;  %v865_v3 = vpop.permute.xlu0 %864  ;;  %v1247_v60 = vsel %vm1240_vm3, %v2353_v10, %v3092_v13 }
 0x158   : > { %1076 = vrot.lane.b32.xlu1 %v4446_v1, %s2449_s29  ;;  %2244 = vmatmul.mubr.msk.f32.gmra.mrb[2].mxu0 %vm1509_vm11, %v1475_v36  ;;  %v1377_v9 = vsel %vm1372_vm7, %v1344_v62, %v865_v3 }
 0x159   : > { %982 = vrot.lane.b32.xlu0 %v4447_v23, %s2448_s25 }
 0x15a   : > { %v961_v40 = vpop.permute.xlu1 %960 }
 0x15b   : > { %v867_v19 = vpop.permute.xlu0 %866  ;;  %v1410_v20 = vsel %vm1405_vm8, %v1377_v9, %v961_v40  ;;  %v4452_v9 = vld [vmem:[#allocation26_spill] sm:$0xff] }
 0x15c   : > { %792 = vrot.lane.b32.xlu1 %v4446_v1, %s2446_s5  ;;  %v2354_v1 = vld [vmem:[%s2528_s28 + $0x50] sm:$0xff] }
 0x15d   : > { %698 = vrot.lane.b32.xlu0 %v4447_v23, %s2445_s4  ;;  %v1248_v23 = vsel %vm1240_vm3, %v2354_v1, %v3090_v8 }
 0x15e   : > { %v1057_v47 = vpop.permute.xlu1 %1056  ;;  %v1281_v13 = vsel %vm1273_vm4, %v1248_v23, %v3233_v24 }
 0x15f   : > { %v963_v56 = vpop.permute.xlu0 %962  ;;  %v1443_v34 = vsel %vm1438_vm9, %v1410_v20, %v1057_v47  ;;  %v3586_v20 = vld [vmem:[%s2528_s28 + $0x110] sm:$0xff] }
 0x160   : > { %1172 = vrot.lane.b32.xlu1 %v2996_v18, %s2450_s30 }
 0x161   : > { %1078 = vrot.lane.b32.xlu0 %v4448_v30, %s2449_s29 }
 0x162   : > { %v1059_v55 = vpop.permute.xlu1 %1058 }
 0x163   : > { %v773_v21 = vpop.permute.xlu0 %772 }
 0x164   : > { %888 = vrot.lane.b32.xlu1 %v2996_v18, %s2447_s10  ;;  %v1378_v18 = vsel %vm1372_vm7, %v1345_v52, %v867_v19 }
 0x165   : > { %794 = vrot.lane.b32.xlu0 %v4448_v30, %s2446_s5  ;;  %v1411_v53 = vsel %vm1405_vm8, %v1378_v18, %v963_v56 }
 0x166   : > { %v775_v63 = vpop.permute.xlu1 %774  ;;  %v1444_v48 = vsel %vm1438_vm9, %v1411_v53, %v1059_v55 }
 0x167   : > { %v1153_v0 = vpop.permute.xlu0 %1152 }
 0x168   : > { %v1476_v14 = vsel %vm1471_vm10, %v1443_v34, %v1153_v0  ;;  %890 = vrot.lane.b32.xlu1 %v2991_v7, %s2447_s10  ;;  %v2358_v0 = vld [vmem:[%s2528_s28 + $0x68] sm:$0xff] }
 0x169   : > { %1174 = vrot.lane.b32.xlu0 %v2991_v7, %s2450_s30  ;;  %2246 = vmatprep.mubr.msk.f32.mxu0 %vm1509_vm11, %v1476_v14  ;;  %v1250_v18 = vsel %vm1240_vm3, %v2358_v0, %v3098_v57  ;;  %v4460_v0 = vld [vmem:[#allocation44_spill] sm:$0xff] }
 0x16a   : > { %v1155_v11 = vpop.permute.xlu1 %1154 }
 0x16b   : > { %v1477_v39 = vsel %vm1471_vm10, %v1444_v48, %v1155_v11  ;;  %v869_v32 = vpop.permute.xlu0 %868 }
 0x16c   : > { %700 = vrot.lane.b32.xlu1 %v2737_v37, %s2445_s4  ;;  %2247 = vmatmul.mubr.msk.f32.gmra.mrb[4].mxu0 %vm1509_vm11, %v1477_v39 }
 0x16d   : > { %984 = vrot.lane.b32.xlu0 %v2737_v37, %s2448_s25  ;;  %v1280_v37 = vsel %vm1273_vm4, %v1247_v60, %v3235_v43  ;;  %v4451_v43 = vld [vmem:[#allocation23_spill] sm:$0xff] }
 0x16e   : > { %v965_v26 = vpop.permute.xlu1 %964  ;;  %v1313_v36 = vsel %vm1306_vm5, %v1280_v37, %v3359_v41  ;;  %v1314_v41 = vsel %vm1306_vm5, %v1281_v13, %v3357_v46  ;;  %v4454_v13 = vld [vmem:[#allocation28_spill] sm:$0xff] }
 0x16f   : > { %v871_v7 = vpop.permute.xlu0 %870  ;;  %v1346_v40 = vsel %vm1339_vm6, %v1313_v36, %v773_v21  ;;  %v1347_v8 = vsel %vm1339_vm6, %v1314_v41, %v775_v63  ;;  %v3633_v36 = vld [vmem:[%s2528_s28 + $0x120] sm:$0xff] }
 0x170   : > { %1080 = vrot.lane.b32.xlu1 %v4449_v4, %s2449_s29  ;;  %v1379_v19 = vsel %vm1372_vm7, %v1346_v40, %v869_v32  ;;  %v1380_v30 = vsel %vm1372_vm7, %v1347_v8, %v871_v7  ;;  %v4453_v7 = vld [vmem:[#allocation25_spill] sm:$0xff] }
 0x171   : > { %986 = vrot.lane.b32.xlu0 %v4450_v38, %s2448_s25  ;;  %v1412_v47 = vsel %vm1405_vm8, %v1379_v19, %v965_v26 }
 0x172   : > { %v1061_v28 = vpop.permute.xlu1 %1060 }
 0x173   : > { %v967_v25 = vpop.permute.xlu0 %966  ;;  %v1445_v2 = vsel %vm1438_vm9, %v1412_v47, %v1061_v28 }
 0x174   : > { %796 = vrot.lane.b32.xlu1 %v4449_v4, %s2446_s5  ;;  %v1413_v54 = vsel %vm1405_vm8, %v1380_v30, %v967_v25 }
 0x175   : > { %702 = vrot.lane.b32.xlu0 %v4450_v38, %s2445_s4 }
 0x176   : > { %v1063_v29 = vpop.permute.xlu1 %1062 }
 0x177   : > { %v777_v3 = vpop.permute.xlu0 %776  ;;  %v1446_v46 = vsel %vm1438_vm9, %v1413_v54, %v1063_v29  ;;  %v2359_v29 = vld [vmem:[%s2528_s28 + $0x78] sm:$0xff] }
 0x178   : > { %1176 = vrot.lane.b32.xlu1 %v3009_v35, %s2450_s30 }
 0x179   : > { %1082 = vrot.lane.b32.xlu0 %v4451_v43, %s2449_s29 }
 0x17a   : > { %v779_v56 = vpop.permute.xlu1 %778 }
 0x17b   : > { %v1157_v51 = vpop.permute.xlu0 %1156 }
 0x17c   : > { %v1478_v24 = vsel %vm1471_vm10, %v1445_v2, %v1157_v51  ;;  %892 = vrot.lane.b32.xlu1 %v3009_v35, %s2447_s10  ;;  %v4455_v2 = vld [vmem:[#allocation7_spill] sm:$0xff] }
 0x17d   : > { %798 = vrot.lane.b32.xlu0 %v4451_v43, %s2446_s5  ;;  %2249 = vmatprep.mubr.msk.f32.mxu0 %vm1509_vm11, %v1478_v24  ;;  %v4456_v24 = vld [vmem:[#allocation13_spill] sm:$0xff] }
 0x17e   : > { %v1159_v55 = vpop.permute.xlu1 %1158 }
 0x17f   : > { %v1479_v6 = vsel %vm1471_vm10, %v1446_v46, %v1159_v55  ;;  %v873_v21 = vpop.permute.xlu0 %872 }
 0x180   : > { %894 = vrot.lane.b32.xlu1 %v3004_v44, %s2447_s10  ;;  %2250 = vmatmul.mubr.msk.f32.gmra.mrb[6].mxu0 %vm1509_vm11, %v1479_v6  ;;  %v4457_v6 = vld [vmem:[#allocation36_spill] sm:$0xff] }
 0x181   : > { %1178 = vrot.lane.b32.xlu0 %v3004_v44, %s2450_s30  ;;  %v1249_v44 = vsel %vm1240_vm3, %v2356_v42, %v3100_v45  ;;  %v1283_v45 = vsel %vm1273_vm4, %v1250_v18, %v3241_v22 }
 0x182   : > { %v969_v35 = vpop.permute.xlu1 %968 }
 0x183   : > { %v875_v16 = vpop.permute.xlu0 %874 }
 0x184   : > { %704 = vrot.lane.b32.xlu1 %v2759_v59, %s2445_s4  ;;  %v1282_v59 = vsel %vm1273_vm4, %v1249_v44, %v3243_v12  ;;  %v1316_v12 = vsel %vm1306_vm5, %v1283_v45, %v3365_v31  ;;  %v4461_v45 = vld [vmem:[#allocation64_spill] sm:$0xff] }
 0x185   : > { %988 = vrot.lane.b32.xlu0 %v3576_v17, %s2448_s25  ;;  %v1315_v52 = vsel %vm1306_vm5, %v1282_v59, %v3367_v33  ;;  %v1349_v57 = vsel %vm1339_vm6, %v1316_v12, %v779_v56  ;;  %v2362_v56 = vld [vmem:[%s2528_s28 + $0x80] sm:$0xff]  ;;  %v4459_v59 = vld [vmem:[#allocation35_spill] sm:$0xff] }
 0x186   : > { %v1065_v62 = vpop.permute.xlu1 %1064  ;;  %v1348_v14 = vsel %vm1339_vm6, %v1315_v52, %v777_v3  ;;  %v1382_v32 = vsel %vm1372_vm7, %v1349_v57, %v875_v16  ;;  %v1252_v8 = vsel %vm1240_vm3, %v2362_v56, %v3106_v50  ;;  %v4458_v50 = vld [vmem:[#allocation27_spill] sm:$0xff]  ;;  %v4462_v12 = vld [vmem:[#allocation12_spill] sm:$0xff]  ;;  %v4468_v56 = vld [vmem:[#allocation37_spill] sm:$0xff] }
 0x187   : > { %v971_v5 = vpop.permute.xlu0 %970  ;;  %v1381_v53 = vsel %vm1372_vm7, %v1348_v14, %v873_v21  ;;  %v1285_v51 = vsel %vm1273_vm4, %v1252_v8, %v4455_v2  ;;  %v3691_v14 = vld [vmem:[%s2528_s28 + $0x138] sm:$0xff] }
 0x188   : > { %1084 = vrot.lane.b32.xlu1 %v4452_v9, %s2449_s29  ;;  %v1414_v33 = vsel %vm1405_vm8, %v1381_v53, %v969_v35  ;;  %v1415_v26 = vsel %vm1405_vm8, %v1382_v32, %v971_v5  ;;  %v1318_v54 = vsel %vm1306_vm5, %v1285_v51, %v4456_v24  ;;  %v4463_v32 = vld [vmem:[#allocation30_spill] sm:$0xff] }
 0x189   : > { %990 = vrot.lane.b32.xlu0 %v3586_v20, %s2448_s25  ;;  %v1447_v11 = vsel %vm1438_vm9, %v1414_v33, %v1065_v62  ;;  %v2367_v51 = vld [vmem:[%s2528_s28 + $0xa8] sm:$0xff] }
 0x18a   : > { %v1067_v63 = vpop.permute.xlu1 %1066 }
 0x18b   : > { %v781_v34 = vpop.permute.xlu0 %780  ;;  %v1448_v31 = vsel %vm1438_vm9, %v1415_v26, %v1067_v63  ;;  %v3709_v26 = vld [vmem:[%s2528_s28 + $0x140] sm:$0xff] }
 0x18c   : > { %800 = vrot.lane.b32.xlu1 %v4452_v9, %s2446_s5 }
 0x18d   : > { %706 = vrot.lane.b32.xlu0 %v3586_v20, %s2445_s4 }
 0x18e   : > { %v783_v48 = vpop.permute.xlu1 %782 }
 0x18f   : > { %v1161_v39 = vpop.permute.xlu0 %1160  ;;  %v1351_v55 = vsel %vm1339_vm6, %v1318_v54, %v783_v48  ;;  %v3749_v54 = vld [vmem:[%s2528_s28 + $0x150] sm:$0xff] }
 0x190   : > { %v1480_v22 = vsel %vm1471_vm10, %v1447_v11, %v1161_v39  ;;  %1180 = vrot.lane.b32.xlu1 %v3022_v58, %s2450_s30 }
 0x191   : > { %1086 = vrot.lane.b32.xlu0 %v4453_v7, %s2449_s29  ;;  %2252 = vmatprep.mubr.msk.f32.mxu0 %vm1509_vm11, %v1480_v22 }
 0x192   : > { %v1163_v4 = vpop.permute.xlu1 %1162 }
 0x193   : > { %v1481_v38 = vsel %vm1471_vm10, %v1448_v31, %v1163_v4  ;;  %v877_v28 = vpop.permute.xlu0 %876 }
 0x194   : > { %896 = vrot.lane.b32.xlu1 %v3022_v58, %s2447_s10  ;;  %2253 = vmatmul.mubr.msk.f32.gmra.mrb[8].mxu0 %vm1509_vm11, %v1481_v38  ;;  %v1251_v58 = vsel %vm1240_vm3, %v2359_v29, %v3108_v27 }
 0x195   : > { %802 = vrot.lane.b32.xlu0 %v4453_v7, %s2446_s5  ;;  %v1284_v3 = vsel %vm1273_vm4, %v1251_v58, %v3251_v15  ;;  %v3651_v15 = vld [vmem:[%s2528_s28 + $0x128] sm:$0xff] }
 0x196   : > { %v973_v25 = vpop.permute.xlu1 %972 }
 0x197   : > { %v879_v10 = vpop.permute.xlu0 %878 }
 0x198   : > { %898 = vrot.lane.b32.xlu1 %v3017_v49, %s2447_s10  ;;  %v1384_v21 = vsel %vm1372_vm7, %v1351_v55, %v879_v10 }
 0x199   : > { %1182 = vrot.lane.b32.xlu0 %v3017_v49, %s2450_s30  ;;  %v1317_v49 = vsel %vm1306_vm5, %v1284_v3, %v3375_v61 }
 0x19a   : > { %v1069_v60 = vpop.permute.xlu1 %1068  ;;  %v1350_v23 = vsel %vm1339_vm6, %v1317_v49, %v781_v34  ;;  %v2363_v34 = vld [vmem:[%s2528_s28 + $0x90] sm:$0xff] }
 0x19b   : > { %v975_v37 = vpop.permute.xlu0 %974  ;;  %v1383_v27 = vsel %vm1372_vm7, %v1350_v23, %v877_v28  ;;  %v1253_v18 = vsel %vm1240_vm3, %v2363_v34, %v4460_v0  ;;  %v2366_v28 = vld [vmem:[%s2528_s28 + $0x98] sm:$0xff]  ;;  %v4472_v34 = vld [vmem:[#allocation45_spill] sm:$0xff] }
 0x19c   : > { %708 = vrot.lane.b32.xlu1 %v3633_v36, %s2445_s4  ;;  %v1416_v19 = vsel %vm1405_vm8, %v1383_v27, %v973_v25  ;;  %v1417_v35 = vsel %vm1405_vm8, %v1384_v21, %v975_v37  ;;  %v1286_v53 = vsel %vm1273_vm4, %v1253_v18, %v4461_v45  ;;  %v4464_v25 = vld [vmem:[#allocation43_spill] sm:$0xff]  ;;  %v4467_v27 = vld [vmem:[#allocation29_spill] sm:$0xff] }
 0x19d   : > { %992 = vrot.lane.b32.xlu0 %v3633_v36, %s2448_s25  ;;  %v1449_v43 = vsel %vm1438_vm9, %v1416_v19, %v1069_v60  ;;  %v1319_v33 = vsel %vm1306_vm5, %v1286_v53, %v4462_v12  ;;  %v1254_v10 = vsel %vm1240_vm3, %v2366_v28, %v4464_v25  ;;  %v4465_v60 = vld [vmem:[#allocation63_spill] sm:$0xff]  ;;  %v4473_v18 = vld [vmem:[#allocation9_spill] sm:$0xff] }
 0x19e   : > { %v785_v1 = vpop.permute.xlu1 %784  ;;  %v1287_v37 = vsel %vm1273_vm4, %v1254_v10, %v4465_v60  ;;  %v4476_v25 = vld [vmem:[#allocation39_spill] sm:$0xff] }
 0x19f   : > { %v3644_v40 = vpop.permute.xlu0 %690  ;;  %v1352_v57 = vsel %vm1339_vm6, %v1319_v33, %v785_v1  ;;  %v4466_v1 = vld [vmem:[#allocation38_spill] sm:$0xff] }
 0x1a0   : > { %1088 = vrot.lane.b32.xlu1 %v4454_v13, %s2449_s29  ;;  %v1320_v58 = vsel %vm1306_vm5, %v1287_v37, %v3644_v40  ;;  %v2371_v37 = vld [vmem:[%s2528_s28 + $0xc0] sm:$0xff] }
 0x1a1   : > { %994 = vrot.lane.b32.xlu0 %v3651_v15, %s2448_s25 }
 0x1a2   : > { %v1165_v61 = vpop.permute.xlu1 %1164 }
 0x1a3   : > { %v1482_v41 = vsel %vm1471_vm10, %v1449_v43, %v1165_v61  ;;  %v1071_v47 = vpop.permute.xlu0 %1070 }
 0x1a4   : > { %804 = vrot.lane.b32.xlu1 %v4454_v13, %s2446_s5  ;;  %2255 = vmatprep.mubr.msk.f32.mxu0 %vm1509_vm11, %v1482_v41  ;;  %v1450_v62 = vsel %vm1438_vm9, %v1417_v35, %v1071_v47 }
 0x1a5   : > { %710 = vrot.lane.b32.xlu0 %v3651_v15, %s2445_s4 }
 0x1a6   : > { %v881_v30 = vpop.permute.xlu1 %880 }
 0x1a7   : > { %v787_v46 = vpop.permute.xlu0 %786  ;;  %v1385_v39 = vsel %vm1372_vm7, %v1352_v57, %v881_v30  ;;  %v4469_v30 = vld [vmem:[#allocation46_spill] sm:$0xff]  ;;  %v4474_v57 = vld [vmem:[#allocation40_spill] sm:$0xff] }
 0x1a8   : > { %1184 = vrot.lane.b32.xlu1 %v4457_v6, %s2450_s30  ;;  %v1353_v49 = vsel %vm1339_vm6, %v1320_v58, %v787_v46  ;;  %v1255_v24 = vsel %vm1240_vm3, %v2367_v51, %v4469_v30  ;;  %v4470_v46 = vld [vmem:[#allocation65_spill] sm:$0xff]  ;;  %v4480_v30 = vld [vmem:[#allocation47_spill] sm:$0xff] }
 0x1a9   : > { %1090 = vrot.lane.b32.xlu0 %v4458_v50, %s2449_s29  ;;  %v1288_v55 = vsel %vm1273_vm4, %v1255_v24, %v4470_v46  ;;  %v2374_v51 = vld [vmem:[%s2528_s28 + $0xc8] sm:$0xff]  ;;  %v4481_v46 = vld [vmem:[#allocation8_spill] sm:$0xff] }
 0x1aa   : > { %v883_v16 = vpop.permute.xlu1 %882  ;;  %v1258_v24 = vsel %vm1240_vm3, %v2374_v51, %v4480_v30 }
 0x1ab   : > { %v1167_v5 = vpop.permute.xlu0 %1166  ;;  %v1386_v23 = vsel %vm1372_vm7, %v1353_v49, %v883_v16  ;;  %v4478_v49 = vld [vmem:[#allocation66_spill] sm:$0xff] }
 0x1ac   : > { %v1483_v9 = vsel %vm1471_vm10, %v1450_v62, %v1167_v5  ;;  %900 = vrot.lane.b32.xlu1 %v4457_v6, %s2447_s10  ;;  %v4471_v62 = vld [vmem:[#allocation32_spill] sm:$0xff] }
 0x1ad   : > { %806 = vrot.lane.b32.xlu0 %v4458_v50, %s2446_s5  ;;  %2256 = vmatmul.mubr.msk.f32.gmra.mrb[10].mxu0 %vm1509_vm11, %v1483_v9  ;;  %v3766_v9 = vld [vmem:[%s2528_s28 + $0x158] sm:$0xff] }
 0x1ae   : > { %v693_v42 = vpop.permute.xlu1 %692 }
 0x1af   : > { %v977_v44 = vpop.permute.xlu0 %976  ;;  %v1321_v6 = vsel %vm1306_vm5, %v1288_v55, %v693_v42  ;;  %v1291_v55 = vsel %vm1273_vm4, %v1258_v24, %v4481_v46 }
 0x1b0   : > { %902 = vrot.lane.b32.xlu1 %v4459_v59, %s2447_s10  ;;  %v1418_v22 = vsel %vm1405_vm8, %v1385_v39, %v977_v44 }
 0x1b1   : > { %1186 = vrot.lane.b32.xlu0 %v4459_v59, %s2450_s30 }
 0x1b2   : > { %v1073_v63 = vpop.permute.xlu1 %1072 }
 0x1b3   : > { %v979_v52 = vpop.permute.xlu0 %978  ;;  %v1451_v7 = vsel %vm1438_vm9, %v1418_v22, %v1073_v63 }
 0x1b4   : > { %712 = vrot.lane.b32.xlu1 %v3691_v14, %s2445_s4  ;;  %v1419_v13 = vsel %vm1405_vm8, %v1386_v23, %v979_v52  ;;  %v2370_v52 = vld [vmem:[%s2528_s28 + $0xb0] sm:$0xff] }
 0x1b5   : > { %996 = vrot.lane.b32.xlu0 %v3691_v14, %s2448_s25  ;;  %v1256_v0 = vsel %vm1240_vm3, %v2370_v52, %v4472_v34 }
 0x1b6   : > { %v789_v48 = vpop.permute.xlu1 %788  ;;  %v1289_v45 = vsel %vm1273_vm4, %v1256_v0, %v4473_v18  ;;  %v230_v0 = vld [vmem:[%s2528_s28 + $0x180] sm:$0xff]  ;;  %v231_v18 = vld [vmem:[%s2528_s28 + $0x188] sm:$0xff] }
 0x1b7   : > { %v3702_v11 = vpop.permute.xlu0 %694  ;;  %v1354_v50 = vsel %vm1339_vm6, %v1321_v6, %v789_v48 }
 0x1b8   : > { %1092 = vrot.lane.b32.xlu1 %v4463_v32, %s2449_s29  ;;  %v1322_v12 = vsel %vm1306_vm5, %v1289_v45, %v3702_v11 }
 0x1b9   : > { %998 = vrot.lane.b32.xlu0 %v3709_v26, %s2448_s25 }
 0x1ba   : > { %v1169_v31 = vpop.permute.xlu1 %1168 }
 0x1bb   : > { %v1484_v4 = vsel %vm1471_vm10, %v1451_v7, %v1169_v31  ;;  %v1075_v38 = vpop.permute.xlu0 %1074 }
 0x1bc   : > { %808 = vrot.lane.b32.xlu1 %v4463_v32, %s2446_s5  ;;  %2258 = vmatprep.mubr.msk.f32.mxu0 %vm1509_vm11, %v1484_v4  ;;  %v1452_v43 = vsel %vm1438_vm9, %v1419_v13, %v1075_v38  ;;  %v4475_v32 = vld [vmem:[#allocation31_spill] sm:$0xff] }
 0x1bd   : > { %714 = vrot.lane.b32.xlu0 %v3709_v26, %s2445_s4 }
 0x1be   : > { %v885_v29 = vpop.permute.xlu1 %884 }
 0x1bf   : > { %v791_v3 = vpop.permute.xlu0 %790  ;;  %v1387_v16 = vsel %vm1372_vm7, %v1354_v50, %v885_v29  ;;  %v4477_v29 = vld [vmem:[#allocation48_spill] sm:$0xff] }
 0x1c0   : > { %1188 = vrot.lane.b32.xlu1 %v4466_v1, %s2450_s30  ;;  %v1355_v48 = vsel %vm1339_vm6, %v1322_v12, %v791_v3  ;;  %v1257_v58 = vsel %vm1240_vm3, %v2371_v37, %v4477_v29  ;;  %v3808_v3 = vld [vmem:[%s2528_s28 + $0x168] sm:$0xff]  ;;  %v449_v12 = vrot.slane %v230_v0, 1 }
 0x1c1   : > { %1094 = vrot.lane.b32.xlu0 %v4467_v27, %s2449_s29 }
 0x1c2   : > { %v887_v19 = vpop.permute.xlu1 %886 }
 0x1c3   : > { %v1171_v61 = vpop.permute.xlu0 %1170  ;;  %v1388_v39 = vsel %vm1372_vm7, %v1355_v48, %v887_v19 }
 0x1c4   : > { %v1485_v40 = vsel %vm1471_vm10, %v1452_v43, %v1171_v61  ;;  %904 = vrot.lane.b32.xlu1 %v4466_v1, %s2447_s10  ;;  %v1290_v1 = vsel %vm1273_vm4, %v1257_v58, %v4478_v49  ;;  %v4479_v61 = vld [vmem:[#allocation34_spill] sm:$0xff]  ;;  %v454_v58 = vrot.slane %v230_v0, 2  ;;  %v455_v49 = vrot.slane %v231_v18, 2 }
 0x1c5   : > { %810 = vrot.lane.b32.xlu0 %v4467_v27, %s2446_s5  ;;  %2259 = vmatmul.mubr.msk.f32.gmra.mrb[12].mxu0 %vm1509_vm11, %v1485_v40 }
 0x1c6   : > { %v697_v41 = vpop.permute.xlu1 %696 }
 0x1c7   : > { %v981_v47 = vpop.permute.xlu0 %980  ;;  %v1323_v23 = vsel %vm1306_vm5, %v1290_v1, %v697_v41 }
 0x1c8   : > { %906 = vrot.lane.b32.xlu1 %v4468_v56, %s2447_s10  ;;  %v1420_v5 = vsel %vm1405_vm8, %v1387_v16, %v981_v47  ;;  %v3825_v47 = vld [vmem:[%s2528_s28 + $0x170] sm:$0xff] }
 0x1c9   : > { %1190 = vrot.lane.b32.xlu0 %v4468_v56, %s2450_s30 }
 0x1ca   : > { %v1077_v8 = vpop.permute.xlu1 %1076 }
 0x1cb   : > { %v983_v2 = vpop.permute.xlu0 %982  ;;  %v1453_v44 = vsel %vm1438_vm9, %v1420_v5, %v1077_v8 }
 0x1cc   : > { %716 = vrot.lane.b32.xlu1 %v3749_v54, %s2445_s4  ;;  %v1421_v22 = vsel %vm1405_vm8, %v1388_v39, %v983_v2  ;;  %v2375_v39 = vld [vmem:[%s2528_s28 + $0xd8] sm:$0xff] }
 0x1cd   : > { %1000 = vrot.lane.b32.xlu0 %v3749_v54, %s2448_s25 }
 0x1ce   : > { %v793_v21 = vpop.permute.xlu1 %792 }
 0x1cf   : > { %v3759_v35 = vpop.permute.xlu0 %698  ;;  %v1356_v13 = vsel %vm1339_vm6, %v1323_v23, %v793_v21 }
 0x1d0   : > { %1096 = vrot.lane.b32.xlu1 %v4471_v62, %s2449_s29  ;;  %v1324_v21 = vsel %vm1306_vm5, %v1291_v55, %v3759_v35 }
 0x1d1   : > { %1002 = vrot.lane.b32.xlu0 %v3766_v9, %s2448_s25 }
 0x1d2   : > { %v1173_v42 = vpop.permute.xlu1 %1172 }
 0x1d3   : > { %v1486_v59 = vsel %vm1471_vm10, %v1453_v44, %v1173_v42  ;;  %v1079_v63 = vpop.permute.xlu0 %1078  ;;  %v4483_v44 = vld [vmem:[#allocation33_spill] sm:$0xff] }
 0x1d4   : > { %812 = vrot.lane.b32.xlu1 %v4471_v62, %s2446_s5  ;;  %2261 = vmatprep.mubr.msk.f32.mxu0 %vm1509_vm11, %v1486_v59  ;;  %v1454_v31 = vsel %vm1438_vm9, %v1421_v22, %v1079_v63  ;;  %v4482_v62 = vld [vmem:[#allocation42_spill] sm:$0xff] }
 0x1d5   : > { %718 = vrot.lane.b32.xlu0 %v3766_v9, %s2445_s4 }
 0x1d6   : > { %v889_v53 = vpop.permute.xlu1 %888 }
 0x1d7   : > { %v795_v33 = vpop.permute.xlu0 %794  ;;  %v1389_v43 = vsel %vm1372_vm7, %v1356_v13, %v889_v53  ;;  %v4484_v53 = vld [vmem:[#allocation41_spill] sm:$0xff] }
 0x1d8   : > { %1192 = vrot.lane.b32.xlu1 %v4474_v57, %s2450_s30  ;;  %v1357_v16 = vsel %vm1339_vm6, %v1324_v21, %v795_v33  ;;  %v450_v33 = vrot.slane %v231_v18, 1 }
 0x1d9   : > { %1098 = vrot.lane.b32.xlu0 %v4475_v32, %s2449_s29 }
 0x1da   : > { %v891_v7 = vpop.permute.xlu1 %890 }
 0x1db   : > { %v1175_v4 = vpop.permute.xlu0 %1174  ;;  %v1390_v5 = vsel %vm1372_vm7, %v1357_v16, %v891_v7  ;;  %v4486_v7 = vld [vmem:[#allocation68_spill] sm:$0xff] }
 0x1dc   : > { %v1487_v11 = vsel %vm1471_vm10, %v1454_v31, %v1175_v4  ;;  %908 = vrot.lane.b32.xlu1 %v4474_v57, %s2447_s10  ;;  %v451_v4 = vsel %vm284_vm0, %v449_v12, %v450_v33  ;;  %v2377_v12 = vld [vmem:[%s2528_s28 + $0xf0] sm:$0xff] }
 0x1dd   : > { %814 = vrot.lane.b32.xlu0 %v4475_v32, %s2446_s5  ;;  %2262 = vmatmul.mubr.msk.f32.gmra.mrb[14].mxu0 %vm1509_vm11, %v1487_v11  ;;  %v4485_v32 = vld [vmem:[#allocation50_spill] sm:$0xff] }
 0x1de   : > { %v3798_v38 = vpop.permute.xlu1 %700  ;;  %v1259_v22 = vsel %vm1240_vm3, %v2375_v39, %v4485_v32 }
 0x1df   : > { %v985_v28 = vpop.permute.xlu0 %984  ;;  %v1292_v31 = vsel %vm1273_vm4, %v1259_v22, %v4486_v7 }
 0x1e0   : > { %910 = vrot.lane.b32.xlu1 %v4476_v25, %s2447_s10  ;;  %v1422_v40 = vsel %vm1405_vm8, %v1389_v43, %v985_v28  ;;  %v1325_v11 = vsel %vm1306_vm5, %v1292_v31, %v3798_v38  ;;  %v2376_v43 = vld [vmem:[%s2528_s28 + $0xe0] sm:$0xff] }
 0x1e1   : > { %1194 = vrot.lane.b32.xlu0 %v4476_v25, %s2450_s30 }
 0x1e2   : > { %v1081_v10 = vpop.permute.xlu1 %1080 }
 0x1e3   : > { %v987_v60 = vpop.permute.xlu0 %986  ;;  %v1455_v56 = vsel %vm1438_vm9, %v1422_v40, %v1081_v10 }
 0x1e4   : > { %720 = vrot.lane.b32.xlu1 %v3808_v3, %s2445_s4  ;;  %v1423_v42 = vsel %vm1405_vm8, %v1390_v5, %v987_v60  ;;  %v232_v60 = vld [vmem:[%s2528_s28 + $0x190] sm:$0x3] }
 0x1e5   : > { %1004 = vrot.lane.b32.xlu0 %v3808_v3, %s2448_s25  ;;  %v452_v23 = vrot.slane %v232_v60, 1 }
 0x1e6   : > { %v797_v27 = vpop.permute.xlu1 %796 }
 0x1e7   : > { %v3818_v19 = vpop.permute.xlu0 %702  ;;  %v1358_v25 = vsel %vm1339_vm6, %v1325_v11, %v797_v27  ;;  %v453_v51 = vsel %vm284_vm0, %v450_v33, %v452_v23  ;;  %v4489_v33 = vld [vmem:[#allocation52_spill] sm:$0xff] }
 0x1e8   : > { %1100 = vrot.lane.b32.xlu1 %v4479_v61, %s2449_s29 }
 0x1e9   : > { %1006 = vrot.lane.b32.xlu0 %v3825_v47, %s2448_s25 }
 0x1ea   : > { %v1177_v41 = vpop.permute.xlu1 %1176 }
 0x1eb   : > { %v1083_v8 = vpop.permute.xlu0 %1082  ;;  %v1488_v2 = vsel %vm1471_vm10, %v1455_v56, %v1177_v41  ;;  %v456_v56 = vsel %vm365_vm1, %v454_v58, %v455_v49  ;;  %v4488_v41 = vld [vmem:[#allocation67_spill] sm:$0xff] }
 0x1ec   : > { %816 = vrot.lane.b32.xlu1 %v4479_v61, %s2446_s5  ;;  %2264 = vmatprep.mubr.msk.f32.mxu1 %vm1509_vm11, %v1488_v2  ;;  %v1456_v63 = vsel %vm1438_vm9, %v1423_v42, %v1083_v8  ;;  %v4487_v61 = vld [vmem:[#allocation49_spill] sm:$0xff] }
 0x1ed   : > { %722 = vrot.lane.b32.xlu0 %v3825_v47, %s2445_s4  ;;  %v1260_v40 = vsel %vm1240_vm3, %v2376_v43, %v4487_v61  ;;  %v234_v42 = vld [vmem:[%s2528_s28 + $0x1a0] sm:$0xff] }
 0x1ee   : > { %v893_v6 = vpop.permute.xlu1 %892  ;;  %v1293_v8 = vsel %vm1273_vm4, %v1260_v40, %v4488_v41  ;;  %v468_v32 = vrot.slane %v234_v42, 2 }
 0x1ef   : > { %v799_v50 = vpop.permute.xlu0 %798  ;;  %v1391_v37 = vsel %vm1372_vm7, %v1358_v25, %v893_v6  ;;  %v1326_v30 = vsel %vm1306_vm5, %v1293_v8, %v3818_v19  ;;  %v457_v6 = vrot.slane %v232_v60, 2 }
 0x1f0   : > { %1196 = vrot.lane.b32.xlu1 %v4482_v62, %s2450_s30  ;;  %v1359_v46 = vsel %vm1339_vm6, %v1326_v30, %v799_v50  ;;  %v2378_v30 = vld [vmem:[%s2528_s28 + $0xf8] sm:$0xff] }
 0x1f1   : > { %1102 = vrot.lane.b32.xlu0 %v4483_v44, %s2449_s29  ;;  %v458_v50 = vsel %vm365_vm1, %v455_v49, %v457_v6  ;;  %v4492_v6 = vld [vmem:[#allocation69_spill] sm:$0xff] }
 0x1f2   : > { %v895_v59 = vpop.permute.xlu1 %894 }
 0x1f3   : > { %v1179_v52 = vpop.permute.xlu0 %1178  ;;  %v1392_v55 = vsel %vm1372_vm7, %v1359_v46, %v895_v59  ;;  %v235_v59 = vld [vmem:[%s2528_s28 + $0x1a8] sm:$0x3]  ;;  %v4491_v46 = vld [vmem:[#allocation51_spill] sm:$0xff] }
 0x1f4   : > { %v1489_v35 = vsel %vm1471_vm10, %v1456_v63, %v1179_v52  ;;  %912 = vrot.lane.b32.xlu1 %v4482_v62, %s2447_s10  ;;  %v233_v52 = vld [vmem:[%s2528_s28 + $0x198] sm:$0xff]  ;;  %v470_v7 = vrot.slane %v235_v59, 2 }
 0x1f5   : > { %818 = vrot.lane.b32.xlu0 %v4483_v44, %s2446_s5  ;;  %2265 = vmatmul.mubr.msk.f32.vlgmr.msra.gmra.mrb[0].mxu1 %vm1509_vm11, %v1489_v35  ;;  %v463_v35 = vrot.slane %v234_v42, 1 }
 0x1f6   : > { %v3857_v34 = vpop.permute.xlu1 %704 }
 0x1f7   : > { %v989_v45 = vpop.permute.xlu0 %988 }
 0x1f8   : > { %914 = vrot.lane.b32.xlu1 %v4484_v53, %s2447_s10  ;;  %v1424_v29 = vsel %vm1405_vm8, %v1391_v37, %v989_v45  ;;  %v462_v45 = vrot.slane %v233_v52, 1 }
 0x1f9   : > { %1198 = vrot.lane.b32.xlu0 %v4484_v53, %s2450_s30 }
 0x1fa   : > { %v1085_v48 = vpop.permute.xlu1 %1084  ;;  %v464_v25 = vsel %vm284_vm0, %v462_v45, %v463_v35 }
 0x1fb   : > { %v991_v57 = vpop.permute.xlu0 %990  ;;  %v1457_v38 = vsel %vm1438_vm9, %v1424_v29, %v1085_v48  ;;  %v1261_v48 = vsel %vm1240_vm3, %v2377_v12, %v4489_v33  ;;  %v4493_v33 = vld [vmem:[#allocation54_spill] sm:$0xff] }
 0x1fc   : > { %724 = vrot.lane.b32.xlu1 %v230_v0, %s2445_s4  ;;  %v1425_v21 = vsel %vm1405_vm8, %v1392_v55, %v991_v57  ;;  %v4490_v57 = vld [vmem:[#allocation70_spill] sm:$0xff]  ;;  %v1262_v55 = vsel %vm1240_vm3, %v2378_v30, %v4491_v46 }
 0x1fd   : > { %1008 = vrot.lane.b32.xlu0 %v230_v0, %s2448_s25  ;;  %v465_v0 = vrot.slane %v235_v59, 1  ;;  %v1294_v39 = vsel %vm1273_vm4, %v1261_v48, %v4490_v57  ;;  %v4494_v48 = vld [vmem:[#allocation72_spill] sm:$0xff] }
 0x1fe   : > { %v3875_v28 = vpop.permute.xlu1 %800  ;;  %v1327_v31 = vsel %vm1306_vm5, %v1294_v39, %v3857_v34 }
 0x1ff   : > { %v3878_v10 = vpop.permute.xlu0 %706  ;;  %v466_v22 = vsel %vm284_vm0, %v463_v35, %v465_v0  ;;  %v1360_v60 = vsel %vm1339_vm6, %v1327_v31, %v3875_v28 }
 0x200   : > { %1104 = vrot.lane.b32.xlu1 %v451_v4, %s2449_s29 }
 0x201   : > { %1010 = vrot.lane.b32.xlu0 %v231_v18, %s2448_s25 }
 0x202   : > { %v1181_v1 = vpop.permute.xlu1 %1180 }
 0x203   : > { %v1490_v27 = vsel %vm1471_vm10, %v1457_v38, %v1181_v1  ;;  %v1087_v13 = vpop.permute.xlu0 %1086 }
 0x204   : > { %820 = vrot.lane.b32.xlu1 %v451_v4, %s2446_s5  ;;  %2267 = vmatprep.mubr.msk.f32.mxu1 %vm1509_vm11, %v1490_v27  ;;  %v1458_v19 = vsel %vm1438_vm9, %v1425_v21, %v1087_v13  ;;  %v467_v4 = vrot.slane %v233_v52, 2  ;;  %v471_v27 = vsel %vm365_vm1, %v468_v32, %v470_v7  ;;  %v1295_v21 = vsel %vm1273_vm4, %v1262_v55, %v4492_v6 }
 0x205   : > { %726 = vrot.lane.b32.xlu0 %v231_v18, %s2445_s4  ;;  %s2192_s4 = sshll.u32 %s2522_s24, 8  ;;  %s169_s24 = sand.u32 1, %s2433_s13  }
 0x206   : > { %v897_v2 = vpop.permute.xlu1 %896  ;;  %s3932_s7 = scalar_lea.vmem %s4273_s2, %s2192_s4  ;;  %s2151_s28 = sshll.u32 %s169_s24, 1 }
 0x207   : > { %v3899_v24 = vpop.permute.xlu0 %802  ;;  %v1393_v58 = vsel %vm1372_vm7, %v1360_v60, %v897_v2  ;;  %s171_s9 = scalar_lea.vmem [#allocation2], %s2151_s28  ;;  %s2047_s20 = scalar_lea.sflag [#allocation3], %s169_s24 }
 0x208   : > { %1200 = vrot.lane.b32.xlu1 %v456_v56, %s2450_s30 }
 0x209   : > { %1106 = vrot.lane.b32.xlu0 %v453_v51, %s2449_s29 }
 0x20a   : > { %v3906_v16 = vpop.permute.xlu1 %898 }
 0x20b   : > { %v1183_v62 = vpop.permute.xlu0 %1182 }
 0x20c   : > { %v1491_v5 = vsel %vm1471_vm10, %v1458_v19, %v1183_v62  ;;  %916 = vrot.lane.b32.xlu1 %v456_v56, %s2447_s10  ;;  %v469_v56 = vsel %vm365_vm1, %v467_v4, %v468_v32  ;;  %v1328_v62 = vsel %vm1306_vm5, %v1295_v21, %v3878_v10 }
 0x20d   : > { %822 = vrot.lane.b32.xlu0 %v453_v51, %s2446_s5  ;;  %2268 = vmatmul.mubr.msk.f32.gmra.mrb[2].mxu1 %vm1509_vm11, %v1491_v5 }
 0x20e   : > { %v3914_v44 = vpop.permute.xlu1 %708 }
 0x20f   : > { %v993_v63 = vpop.permute.xlu0 %992 }
 0x210   : > { %918 = vrot.lane.b32.xlu1 %v458_v50, %s2447_s10  ;;  %v1426_v1 = vsel %vm1405_vm8, %v1393_v58, %v993_v63  ;;  %s2063_s10 = sshll.u32 %s171_s9, 4  ;;  %s4231_s10 = int_to_ptr.vmem [resolvable:$true] %s2063_s10 }
 0x211   : > { %1202 = vrot.lane.b32.xlu0 %v458_v50, %s2450_s30  ;;  %v1361_v50 = vsel %vm1339_vm6, %v1328_v62, %v3899_v24  ;;  %s2379_s16 = scalar_lea.vmem %s4231_s10, 32 }
 0x212   : > { %v1089_v18 = vpop.permute.xlu1 %1088  ;;  %p2380_p11 = scmp.ne.s32.totalorder %s4231_s10, %s2379_s16 }
 0x213   : > { %v995_v53 = vpop.permute.xlu0 %994  ;;  %v1459_v13 = vsel %vm1438_vm9, %v1426_v1, %v1089_v18 }
 0x214   : > { %1014 = vrot.lane.b32.xlu1 %v234_v42, %s2448_s25  ;;  %v1394_v42 = vsel %vm1372_vm7, %v1361_v50, %v3906_v16  ;;  %v1263_v16 = vsel %vm1240_vm3, %v3576_v17, %v4493_v33  ;;  %v4498_v33 = vld [vmem:[#allocation73_spill] sm:$0xff]  ;;  %p2381_p12 = pnand %p2380_p11, %p2510_p5 }
 0x215   : > { %1012 = vrot.lane.b32.xlu0 %v233_v52, %s2448_s25  ;;  %v1427_v59 = vsel %vm1405_vm8, %v1394_v42, %v995_v53  ;;  %v1296_v57 = vsel %vm1273_vm4, %v1263_v16, %v4494_v48  ;;  %s2451_s25 = smov [#allocation2]  }
 0x216   : > { %v805_v11 = vpop.permute.xlu1 %804  ;;  %v1329_v7 = vsel %vm1306_vm5, %v1296_v57, %v3914_v44  ;;  %p2382_p13 = pneg %p2381_p12  ;;  %s2383_s26 = sshll.u32 %s2451_s25, 4  ;;  %s2384_s26 = int_to_ptr.vmem [resolvable:$false] %s2383_s26 }
 0x217   : > { %v3940_v37 = vpop.permute.xlu0 %710  ;;  %v2242_v29 = vpop.f32.mrb[0].mxu0  ;;  %s2385_s27 = scalar_lea.vmem %s2384_s26, 64  ;;  %p2386_p0 = scmp.lt.s32.totalorder %s4231_s10, %s2384_s26 }
 0x218   : > { %1836 = vst.msk [vmem:[%s3932_s7 + $0x8] sm:$0xff] %vm1273_vm4, %v2242_v29  ;;  %v1868_v49 = vsel %vm1273_vm4, %v2242_v29, 0.0  ;;  %v1937_v38 = vmul.f32 %v2242_v29, %v2242_v29  ;;  %1110 = vrot.lane.b32.xlu1 %v466_v22, %s2449_s29  ;;  %v1676_v34 = vpop.f32.mrb[1].mxu0  ;;  %p2387_p1 = scmp.lt.s32.totalorder %s2385_s27, %s2379_s16 }
 0x219   : > { %1835 = vst.msk [vmem:[%s3932_s7] sm:$0xff] %vm1273_vm4, %v1676_v34  ;;  %v1867_v28 = vsel %vm1273_vm4, %v1676_v34, 0.0  ;;  %v1936_v23 = vmul.f32 %v1676_v34, %v1676_v34  ;;  %1108 = vrot.lane.b32.xlu0 %v464_v25, %s2449_s29  ;;  %v1362_v25 = vsel %vm1339_vm6, %v1329_v7, %v805_v11 }
 0x21a   : > { %v1969_v43 = vsel %vm1273_vm4, %v1937_v38, 0.0  ;;  %v1869_v61 = vadd.f32 %v1868_v49, %v1867_v28  ;;  %v1185_v40 = vpop.permute.xlu1 %1184  ;;  %p2388_p2 = por %p2387_p1, %p2386_p0 }
 0x21b   : > { %v1968_v41 = vsel %vm1273_vm4, %v1936_v23, 0.0  ;;  %v1492_v8 = vsel %vm1471_vm10, %v1459_v13, %v1185_v40  ;;  %v1091_v2 = vpop.permute.xlu0 %1090  ;;  %v4495_v13 = vld [vmem:[#allocation53_spill] sm:$0xff] }
 0x21c   : > { %v1970_v51 = vadd.f32 %v1969_v43, %v1968_v41  ;;  %1206 = vrot.lane.b32.xlu1 %v471_v27, %s2450_s30  ;;  %2270 = vmatprep.mubr.msk.f32.mxu1 %vm1509_vm11, %v1492_v8  ;;  %v1460_v52 = vsel %vm1438_vm9, %v1427_v59, %v1091_v2  ;;  %v1264_v43 = vsel %vm1240_vm3, %v3586_v20, %v4495_v13  ;;  %p2389_p3 = pnand %p2388_p2, %p2382_p13 }
 0x21d   : > { %1204 = vrot.lane.b32.xlu0 %v469_v56, %s2450_s30 }
 0x21e   : > { %v901_v19 = vpop.permute.xlu1 %900 }
 0x21f   : > { %v807_v5 = vpop.permute.xlu0 %806  ;;  %v1395_v58 = vsel %vm1372_vm7, %v1362_v25, %v901_v19 }
 0x222   : > { %v903_v63 = vpop.permute.xlu1 %902 }
 0x223   : > { %v1187_v35 = vpop.permute.xlu0 %1186 }
 0x224   : > { %v1493_v0 = vsel %vm1471_vm10, %v1460_v52, %v1187_v35 }
 0x225   : > { %2271 = vmatmul.mubr.msk.f32.gmra.mrb[4].mxu1 %vm1509_vm11, %v1493_v0 }
 0x226   : > { %v3976_v10 = vpop.permute.xlu1 %712 }
 0x227   : > { %v997_v18 = vpop.permute.xlu0 %996 }
 0x228   : > { %v1428_v34 = vsel %vm1405_vm8, %v1395_v58, %v997_v18  ;;  %v4497_v18 = vld [vmem:[#allocation56_spill] sm:$0xff]  ;;  %v4499_v58 = vld [vmem:[#allocation55_spill] sm:$0xff] }
 0x22a   : > { %v1093_v45 = vpop.permute.xlu1 %1092 }
 0x22b   : > { %v999_v12 = vpop.permute.xlu0 %998  ;;  %v2245_v24 = vpop.f32.mrb[2].mxu0  ;;  %v1461_v28 = vsel %vm1438_vm9, %v1428_v34, %v1093_v45  ;;  %v1265_v45 = vsel %vm1240_vm3, %v3633_v36, %v4497_v18 }
 0x22c   : > { %1838 = vst.msk [vmem:[%s3932_s7 + $0x18] sm:$0xff] %vm1273_vm4, %v2245_v24  ;;  %v1686_v53 = vpop.f32.mrb[3].mxu0  ;;  %v1939_v39 = vmul.f32 %v2245_v24, %v2245_v24  ;;  %v1872_v17 = vsel %vm1273_vm4, %v2245_v24, 0.0  ;;  %v1298_v16 = vsel %vm1273_vm4, %v1265_v45, %v4498_v33  ;;  %v4503_v33 = vld [vmem:[#allocation57_spill] sm:$0xff] }
 0x22d   : > { %1837 = vst.msk [vmem:[%s3932_s7 + $0x10] sm:$0xff] %vm1273_vm4, %v1686_v53  ;;  %v1870_v32 = vsel %vm1273_vm4, %v1686_v53, 0.0  ;;  %v1938_v22 = vmul.f32 %v1686_v53, %v1686_v53  ;;  %v1331_v48 = vsel %vm1306_vm5, %v1298_v16, %v3976_v10  ;;  %v1266_v10 = vsel %vm1240_vm3, %v3651_v15, %v4499_v58  ;;  %v4504_v16 = vld [vmem:[#allocation10_spill] sm:$0xff] }
 0x22e   : > { %v1871_v31 = vadd.f32 %v1870_v32, %v1869_v61  ;;  %v809_v4 = vpop.permute.xlu1 %808  ;;  %v1973_v1 = vsel %vm1273_vm4, %v1939_v39, 0.0  ;;  %v4496_v61 = vld [vmem:[#allocation71_spill] sm:$0xff] }
 0x22f   : > { %v1971_v60 = vsel %vm1273_vm4, %v1938_v22, 0.0  ;;  %v715_v29 = vpop.permute.xlu0 %714  ;;  %v1297_v40 = vsel %vm1273_vm4, %v1264_v43, %v4496_v61  ;;  %v1364_v32 = vsel %vm1339_vm6, %v1331_v48, %v809_v4 }
 0x230   : > { %v1972_v49 = vadd.f32 %v1971_v60, %v1970_v51  ;;  %v1873_v38 = vadd.f32 %v1872_v17, %v1871_v31  ;;  %v1330_v41 = vsel %vm1306_vm5, %v1297_v40, %v3940_v37 }
 0x231   : > { %v1363_v2 = vsel %vm1339_vm6, %v1330_v41, %v807_v5 }
 0x232   : > { %v1189_v44 = vpop.permute.xlu1 %1188  ;;  %v1974_v23 = vadd.f32 %v1973_v1, %v1972_v49  ;;  %v1396_v51 = vsel %vm1372_vm7, %v1363_v2, %v903_v63  ;;  %v4500_v49 = vld [vmem:[#allocation11_spill] sm:$0xff] }
 0x233   : > { %v1494_v27 = vsel %vm1471_vm10, %v1461_v28, %v1189_v44  ;;  %v1095_v11 = vpop.permute.xlu0 %1094  ;;  %v1429_v30 = vsel %vm1405_vm8, %v1396_v51, %v999_v12  ;;  %v1299_v4 = vsel %vm1273_vm4, %v1266_v10, %v4500_v49 }
 0x234   : > { %2273 = vmatprep.mubr.msk.f32.mxu1 %vm1509_vm11, %v1494_v27  ;;  %v1462_v55 = vsel %vm1438_vm9, %v1429_v30, %v1095_v11  ;;  %v1332_v34 = vsel %vm1306_vm5, %v1299_v4, %v715_v29 }
 0x236   : > { %v905_v56 = vpop.permute.xlu1 %904 }
 0x237   : > { %v811_v8 = vpop.permute.xlu0 %810  ;;  %v1397_v7 = vsel %vm1372_vm7, %v1364_v32, %v905_v56 }
 0x238   : > { %v1365_v28 = vsel %vm1339_vm6, %v1332_v34, %v811_v8 }
 0x23a   : > { %v907_v46 = vpop.permute.xlu1 %906 }
 0x23b   : > { %v1191_v20 = vpop.permute.xlu0 %1190  ;;  %v1398_v44 = vsel %vm1372_vm7, %v1365_v28, %v907_v46 }
 0x23c   : > { %v1495_v6 = vsel %vm1471_vm10, %v1462_v55, %v1191_v20 }
 0x23d   : > { %2274 = vmatmul.mubr.msk.f32.gmra.mrb[6].mxu1 %vm1509_vm11, %v1495_v6 }
 0x23e   : > { %v4012_v21 = vpop.permute.xlu1 %716 }
 0x23f   : > { %v1001_v19 = vpop.permute.xlu0 %1000  ;;  %v2248_v37 = vpop.f32.mrb[4].mxu0 }
 0x240   : > { %1840 = vst.msk [vmem:[%s3932_s7 + $0x28] sm:$0xff] %vm1273_vm4, %v2248_v37  ;;  %v1696_v62 = vpop.f32.mrb[5].mxu0  ;;  %v1941_v5 = vmul.f32 %v2248_v37, %v2248_v37  ;;  %v1876_v52 = vsel %vm1273_vm4, %v2248_v37, 0.0  ;;  %v1430_v31 = vsel %vm1405_vm8, %v1397_v7, %v1001_v19 }
 0x241   : > { %1839 = vst.msk [vmem:[%s3932_s7 + $0x20] sm:$0xff] %vm1273_vm4, %v1696_v62  ;;  %v1874_v50 = vsel %vm1273_vm4, %v1696_v62, 0.0  ;;  %v1940_v42 = vmul.f32 %v1696_v62, %v1696_v62  ;;  %v4501_v62 = vld [vmem:[#allocation58_spill] sm:$0xff] }
 0x242   : > { %v1875_v59 = vadd.f32 %v1874_v50, %v1873_v38  ;;  %v1097_v63 = vpop.permute.xlu1 %1096  ;;  %v1977_v53 = vsel %vm1273_vm4, %v1941_v5, 0.0  ;;  %v1267_v5 = vsel %vm1240_vm3, %v3691_v14, %v4501_v62  ;;  %v4502_v50 = vld [vmem:[#allocation74_spill] sm:$0xff] }
 0x243   : > { %v1975_v35 = vsel %vm1273_vm4, %v1940_v42, 0.0  ;;  %v1003_v0 = vpop.permute.xlu0 %1002  ;;  %v1463_v36 = vsel %vm1438_vm9, %v1430_v31, %v1097_v63  ;;  %v1300_v42 = vsel %vm1273_vm4, %v1267_v5, %v4502_v50 }
 0x244   : > { %v1976_v12 = vadd.f32 %v1975_v35, %v1974_v23  ;;  %v1877_v24 = vadd.f32 %v1876_v52, %v1875_v59  ;;  %v1431_v23 = vsel %vm1405_vm8, %v1398_v44, %v1003_v0  ;;  %v1333_v59 = vsel %vm1306_vm5, %v1300_v42, %v4012_v21 }
 0x245   : > { %v1268_v21 = vsel %vm1240_vm3, %v3709_v26, %v4503_v33 }
 0x246   : > { %v813_v57 = vpop.permute.xlu1 %812  ;;  %v1978_v39 = vadd.f32 %v1977_v53, %v1976_v12  ;;  %v1301_v53 = vsel %vm1273_vm4, %v1268_v21, %v4504_v16 }
 0x247   : > { %v719_v22 = vpop.permute.xlu0 %718  ;;  %v1366_v52 = vsel %vm1339_vm6, %v1333_v59, %v813_v57 }
 0x248   : > { %v1334_v57 = vsel %vm1306_vm5, %v1301_v53, %v719_v22 }
 0x24a   : > { %v1193_v25 = vpop.permute.xlu1 %1192 }
 0x24b   : > { %v1496_v17 = vsel %vm1471_vm10, %v1463_v36, %v1193_v25  ;;  %v1099_v60 = vpop.permute.xlu0 %1098 }
 0x24c   : > { %2276 = vmatprep.mubr.msk.f32.mxu1 %vm1509_vm11, %v1496_v17  ;;  %v1464_v11 = vsel %vm1438_vm9, %v1431_v23, %v1099_v60 }
 0x24e   : > { %v909_v38 = vpop.permute.xlu1 %908 }
 0x24f   : > { %v815_v1 = vpop.permute.xlu0 %814  ;;  %v1399_v0 = vsel %vm1372_vm7, %v1366_v52, %v909_v38 }
 0x250   : > { %v1367_v7 = vsel %vm1339_vm6, %v1334_v57, %v815_v1 }
 0x252   : > { %v911_v27 = vpop.permute.xlu1 %910 }
 0x253   : > { %v1195_v13 = vpop.permute.xlu0 %1194  ;;  %v2251_v43 = vpop.f32.mrb[6].mxu0  ;;  %v1400_v36 = vsel %vm1372_vm7, %v1367_v7, %v911_v27 }
 0x254   : > { %v1497_v15 = vsel %vm1471_vm10, %v1464_v11, %v1195_v13  ;;  %1842 = vst.msk [vmem:[%s3932_s7 + $0x38] sm:$0xff] %vm1273_vm4, %v2251_v43  ;;  %v1706_v61 = vpop.f32.mrb[7].mxu0  ;;  %v1943_v40 = vmul.f32 %v2251_v43, %v2251_v43  ;;  %v1880_v2 = vsel %vm1273_vm4, %v2251_v43, 0.0 }
 0x255   : > { %1841 = vst.msk [vmem:[%s3932_s7 + $0x30] sm:$0xff] %vm1273_vm4, %v1706_v61  ;;  %v1878_v29 = vsel %vm1273_vm4, %v1706_v61, 0.0  ;;  %v1942_v56 = vmul.f32 %v1706_v61, %v1706_v61  ;;  %2277 = vmatmul.mubr.msk.f32.gmra.mrb[8].mxu1 %vm1509_vm11, %v1497_v15  ;;  %v4505_v15 = vld [vmem:[#allocation60_spill] sm:$0xff] }
 0x256   : > { %v1879_v41 = vadd.f32 %v1878_v29, %v1877_v24  ;;  %v721_v8 = vpop.permute.xlu1 %720  ;;  %v1981_v20 = vsel %vm1273_vm4, %v1943_v40, 0.0  ;;  %v1269_v61 = vsel %vm1240_vm3, %v3749_v54, %v4505_v15  ;;  %v4506_v40 = vld [vmem:[#allocation76_spill] sm:$0xff] }
 0x257   : > { %v1979_v51 = vsel %vm1273_vm4, %v1942_v56, 0.0  ;;  %v1005_v30 = vpop.permute.xlu0 %1004  ;;  %v1302_v29 = vsel %vm1273_vm4, %v1269_v61, %v4506_v40 }
 0x258   : > { %v1980_v46 = vadd.f32 %v1979_v51, %v1978_v39  ;;  %v1881_v55 = vadd.f32 %v1880_v2, %v1879_v41  ;;  %v1432_v18 = vsel %vm1405_vm8, %v1399_v0, %v1005_v30  ;;  %v1335_v56 = vsel %vm1306_vm5, %v1302_v29, %v721_v8 }
 0x25a   : > { %v1101_v6 = vpop.permute.xlu1 %1100  ;;  %v1982_v19 = vadd.f32 %v1981_v20, %v1980_v46 }
 0x25b   : > { %v1007_v37 = vpop.permute.xlu0 %1006  ;;  %v1465_v45 = vsel %vm1438_vm9, %v1432_v18, %v1101_v6 }
 0x25c   : > { %v1433_v60 = vsel %vm1405_vm8, %v1400_v36, %v1007_v37  ;;  %v4508_v37 = vld [vmem:[#allocation75_spill] sm:$0xff]  ;;  %v4509_v36 = vld [vmem:[#allocation61_spill] sm:$0xff] }
 0x25e   : > { %v817_v63 = vpop.permute.xlu1 %816 }
 0x25f   : > { %v723_v35 = vpop.permute.xlu0 %722  ;;  %v1368_v2 = vsel %vm1339_vm6, %v1335_v56, %v817_v63 }
 0x262   : > { %v1197_v12 = vpop.permute.xlu1 %1196 }
 0x263   : > { %v1498_v14 = vsel %vm1471_vm10, %v1465_v45, %v1197_v12  ;;  %v1103_v24 = vpop.permute.xlu0 %1102 }
 0x264   : > { %2279 = vmatprep.mubr.msk.f32.mxu1 %vm1509_vm11, %v1498_v14  ;;  %v1466_v22 = vsel %vm1438_vm9, %v1433_v60, %v1103_v24  ;;  %v4511_v60 = vld [vmem:[#allocation77_spill] sm:$0xff] }
 0x266   : > { %v913_v48 = vpop.permute.xlu1 %912 }
 0x267   : > { %v819_v39 = vpop.permute.xlu0 %818  ;;  %v2254_v32 = vpop.f32.mrb[8].mxu0  ;;  %v1401_v30 = vsel %vm1372_vm7, %v1368_v2, %v913_v48 }
 0x268   : > { %1844 = vst.msk [vmem:[%s3932_s7 + $0x48] sm:$0xff] %vm1273_vm4, %v2254_v32  ;;  %v1716_v31 = vpop.f32.mrb[9].mxu0  ;;  %v1945_v25 = vmul.f32 %v2254_v32, %v2254_v32  ;;  %v1884_v49 = vsel %vm1273_vm4, %v2254_v32, 0.0 }
 0x269   : > { %1843 = vst.msk [vmem:[%s3932_s7 + $0x40] sm:$0xff] %vm1273_vm4, %v1716_v31  ;;  %v1882_v26 = vsel %vm1273_vm4, %v1716_v31, 0.0  ;;  %v1944_v17 = vmul.f32 %v1716_v31, %v1716_v31 }
 0x26a   : > { %v1883_v58 = vadd.f32 %v1882_v26, %v1881_v55  ;;  %v915_v10 = vpop.permute.xlu1 %914  ;;  %v1985_v44 = vsel %vm1273_vm4, %v1945_v25, 0.0  ;;  %v1272_v25 = vsel %vm1240_vm3, %v3825_v47, %v4509_v36  ;;  %v4510_v26 = vld [vmem:[#allocation62_spill] sm:$0xff] }
 0x26b   : > { %v1983_v4 = vsel %vm1273_vm4, %v1944_v17, 0.0  ;;  %v1199_v38 = vpop.permute.xlu0 %1198  ;;  %v1271_v17 = vsel %vm1240_vm3, %v3808_v3, %v4510_v26 }
 0x26c   : > { %v1984_v34 = vadd.f32 %v1983_v4, %v1982_v19  ;;  %v1499_v1 = vsel %vm1471_vm10, %v1466_v22, %v1199_v38  ;;  %v1885_v28 = vadd.f32 %v1884_v49, %v1883_v58  ;;  %v4507_v19 = vld [vmem:[#allocation59_spill] sm:$0xff]  ;;  %v1305_v58 = vsel %vm1273_vm4, %v1272_v25, %v4511_v60 }
 0x26d   : > { %2280 = vmatmul.mubr.msk.f32.gmra.mrb[10].mxu1 %vm1509_vm11, %v1499_v1  ;;  %v1270_v8 = vsel %vm1240_vm3, %v3766_v9, %v4507_v19 }
 0x26e   : > { %v725_v23 = vpop.permute.xlu1 %724  ;;  %v1986_v27 = vadd.f32 %v1985_v44, %v1984_v34  ;;  %v1303_v62 = vsel %vm1273_vm4, %v1270_v8, %v4508_v37 }
 0x26f   : > { %v1009_v11 = vpop.permute.xlu0 %1008  ;;  %v1336_v50 = vsel %vm1306_vm5, %v1303_v62, %v723_v35 }
 0x270   : > { %v1434_v46 = vsel %vm1405_vm8, %v1401_v30, %v1009_v11  ;;  %v1369_v59 = vsel %vm1339_vm6, %v1336_v50, %v819_v39 }
 0x271   : > { %v1402_v52 = vsel %vm1372_vm7, %v1369_v59, %v915_v10  ;;  %v4512_v10 = vld [vmem:[#allocation78_spill] sm:$0xff] }
 0x272   : > { %v1105_v13 = vpop.permute.xlu1 %1104  ;;  %v1304_v22 = vsel %vm1273_vm4, %v1271_v17, %v4512_v10 }
 0x273   : > { %v1011_v43 = vpop.permute.xlu0 %1010  ;;  %v1467_v55 = vsel %vm1438_vm9, %v1434_v46, %v1105_v13  ;;  %v1337_v38 = vsel %vm1306_vm5, %v1304_v22, %v725_v23 }
 0x274   : > { %v1435_v18 = vsel %vm1405_vm8, %v1402_v52, %v1011_v43 }
 0x276   : > { %v821_v41 = vpop.permute.xlu1 %820 }
 0x277   : > { %v727_v51 = vpop.permute.xlu0 %726  ;;  %v1370_v47 = vsel %vm1339_vm6, %v1337_v38, %v821_v41 }
 0x278   : > { %v1338_v49 = vsel %vm1306_vm5, %v1305_v58, %v727_v51 }
 0x27a   : > { %v1201_v20 = vpop.permute.xlu1 %1200 }
 0x27b   : > { %v1500_v54 = vsel %vm1471_vm10, %v1467_v55, %v1201_v20  ;;  %v1107_v6 = vpop.permute.xlu0 %1106 }
 0x27c   : > { %2282 = vmatprep.mubr.msk.f32.mxu1 %vm1509_vm11, %v1500_v54  ;;  %v1468_v35 = vsel %vm1438_vm9, %v1435_v18, %v1107_v6 }
 0x27e   : > { %v917_v5 = vpop.permute.xlu1 %916 }
 0x27f   : > { %v823_v42 = vpop.permute.xlu0 %822  ;;  %v1403_v3 = vsel %vm1372_vm7, %v1370_v47, %v917_v5 }
 0x280   : > { %v2257_v63 = vpop.f32.mrb[10].mxu0  ;;  %v1371_v34 = vsel %vm1339_vm6, %v1338_v49, %v823_v42 }
 0x281   : > { %1846 = vst.msk [vmem:[%s3932_s7 + $0x58] sm:$0xff] %vm1273_vm4, %v2257_v63  ;;  %v1726_v0 = vpop.f32.mrb[11].mxu0  ;;  %v1947_v45 = vmul.f32 %v2257_v63, %v2257_v63  ;;  %v1888_v21 = vsel %vm1273_vm4, %v2257_v63, 0.0 }
 0x282   : > { %1845 = vst.msk [vmem:[%s3932_s7 + $0x50] sm:$0xff] %vm1273_vm4, %v1726_v0  ;;  %v1886_v9 = vsel %vm1273_vm4, %v1726_v0, 0.0  ;;  %v1946_v12 = vmul.f32 %v1726_v0, %v1726_v0  ;;  %v919_v14 = vpop.permute.xlu1 %918 }
 0x283   : > { %v1887_v24 = vadd.f32 %v1886_v9, %v1885_v28  ;;  %v1203_v33 = vpop.permute.xlu0 %1202  ;;  %v1989_v39 = vsel %vm1273_vm4, %v1947_v45, 0.0  ;;  %v1404_v28 = vsel %vm1372_vm7, %v1371_v34, %v919_v14 }
 0x284   : > { %v1987_v16 = vsel %vm1273_vm4, %v1946_v12, 0.0  ;;  %v1501_v53 = vsel %vm1471_vm10, %v1468_v35, %v1203_v33 }
 0x285   : > { %v1988_v48 = vadd.f32 %v1987_v16, %v1986_v27  ;;  %2283 = vmatmul.mubr.msk.f32.gmra.mrb[12].mxu1 %vm1509_vm11, %v1501_v53  ;;  %v1889_v57 = vadd.f32 %v1888_v21, %v1887_v24 }
 0x286   : > { %v1015_v32 = vpop.permute.xlu1 %1014 }
 0x287   : > { %v1013_v7 = vpop.permute.xlu0 %1012  ;;  %v1990_v31 = vadd.f32 %v1989_v39, %v1988_v48  ;;  %v1437_v44 = vsel %vm1405_vm8, %v1404_v28, %v1015_v32 }
 0x288   : > { %v1436_v27 = vsel %vm1405_vm8, %v1403_v3, %v1013_v7 }
 0x28a   : > { %v1111_v4 = vpop.permute.xlu1 %1110 }
 0x28b   : > { %v1109_v1 = vpop.permute.xlu0 %1108  ;;  %v1470_v11 = vsel %vm1438_vm9, %v1437_v44, %v1111_v4 }
 0x28c   : > { %v1469_v23 = vsel %vm1438_vm9, %v1436_v27, %v1109_v1 }
 0x28e   : > { %v1207_v13 = vpop.permute.xlu1 %1206 }
 0x28f   : > { %v1503_v43 = vsel %vm1471_vm10, %v1470_v11, %v1207_v13  ;;  %v1205_v15 = vpop.permute.xlu0 %1204 }
 0x290   : > { %v1502_v61 = vsel %vm1471_vm10, %v1469_v23, %v1205_v15 }
 0x291   : > { %2285 = vmatprep.mubr.msk.f32.mxu1 %vm1509_vm11, %v1502_v61 }
 0x292   : > { %2286 = vmatmul.mubr.msk.f32.gmra.mrb[14].mxu1 %vm1509_vm11, %v1503_v43 }
 0x298   : > { %v2260_v40 = vpop.f32.mrb[12].mxu0 }
 0x299   : > { %1848 = vst.msk [vmem:[%s3932_s7 + $0x68] sm:$0xff] %vm1273_vm4, %v2260_v40  ;;  %v1736_v29 = vpop.f32.mrb[13].mxu0  ;;  %v1949_v56 = vmul.f32 %v2260_v40, %v2260_v40  ;;  %v1892_v30 = vsel %vm1273_vm4, %v2260_v40, 0.0 }
 0x29a   : > { %1847 = vst.msk [vmem:[%s3932_s7 + $0x60] sm:$0xff] %vm1273_vm4, %v1736_v29  ;;  %v1890_v41 = vsel %vm1273_vm4, %v1736_v29, 0.0  ;;  %v1948_v2 = vmul.f32 %v1736_v29, %v1736_v29 }
 0x29b   : > { %v1891_v51 = vadd.f32 %v1890_v41, %v1889_v57  ;;  %v1993_v54 = vsel %vm1273_vm4, %v1949_v56, 0.0 }
 0x29c   : > { %v1991_v46 = vsel %vm1273_vm4, %v1948_v2, 0.0 }
 0x29d   : > { %v1992_v55 = vadd.f32 %v1991_v46, %v1990_v31  ;;  %v1893_v20 = vadd.f32 %v1892_v30, %v1891_v51 }
 0x29f   : > { %v1994_v6 = vadd.f32 %v1993_v54, %v1992_v55 }
 0x2b0   : > { %v2263_v19 = vpop.f32.mrb[14].mxu0 }
 0x2b1   : > { %1850 = vst.msk [vmem:[%s3932_s7 + $0x78] sm:$0xff] %vm1273_vm4, %v2263_v19  ;;  %v1746_v8 = vpop.f32.mrb[15].mxu0  ;;  %v1951_v37 = vmul.f32 %v2263_v19, %v2263_v19  ;;  %v1896_v42 = vsel %vm1273_vm4, %v2263_v19, 0.0 }
 0x2b2   : > { %1849 = vst.msk [vmem:[%s3932_s7 + $0x70] sm:$0xff] %vm1273_vm4, %v1746_v8  ;;  %v1894_v62 = vsel %vm1273_vm4, %v1746_v8, 0.0  ;;  %v1950_v5 = vmul.f32 %v1746_v8, %v1746_v8 }
 0x2b3   : > { %v1895_v50 = vadd.f32 %v1894_v62, %v1893_v20  ;;  %v1997_v0 = vsel %vm1273_vm4, %v1951_v37, 0.0 }
 0x2b4   : > { %v1995_v59 = vsel %vm1273_vm4, %v1950_v5, 0.0 }
 0x2b5   : > { %v1897_v63 = vadd.f32 %v1896_v42, %v1895_v50  ;;  %v1996_v52 = vadd.f32 %v1995_v59, %v1994_v6 }
 0x2b7   : > { %v1998_v18 = vadd.f32 %v1997_v0, %v1996_v52 }
 0x2c8   : > { %v2266_v45 = vpop.f32.mrb[0].mxu1 }
 0x2c9   : > { %1852 = vst.msk [vmem:[%s3932_s7 + $0x88] sm:$0xff] %vm1273_vm4, %v2266_v45  ;;  %v1756_v9 = vpop.f32.mrb[1].mxu1  ;;  %v1953_v12 = vmul.f32 %v2266_v45, %v2266_v45  ;;  %v1900_v33 = vsel %vm1273_vm4, %v2266_v45, 0.0 }
 0x2ca   : > { %1851 = vst.msk [vmem:[%s3932_s7 + $0x80] sm:$0xff] %vm1273_vm4, %v1756_v9  ;;  %v1898_v14 = vsel %vm1273_vm4, %v1756_v9, 0.0  ;;  %v1952_v35 = vmul.f32 %v1756_v9, %v1756_v9 }
 0x2cb   : > { %v1899_v24 = vadd.f32 %v1898_v14, %v1897_v63  ;;  %v2001_v48 = vsel %vm1273_vm4, %v1953_v12, 0.0 }
 0x2cc   : > { %v1999_v21 = vsel %vm1273_vm4, %v1952_v35, 0.0 }
 0x2cd   : > { %v2000_v16 = vadd.f32 %v1999_v21, %v1998_v18  ;;  %v1901_v53 = vadd.f32 %v1900_v33, %v1899_v24 }
 0x2cf   : > { %v2002_v57 = vadd.f32 %v2001_v48, %v2000_v16 }
 0x2e0   : > { %v2269_v39 = vpop.f32.mrb[2].mxu1 }
 0x2e1   : > { %1854 = vst.msk [vmem:[%s3932_s7 + $0x98] sm:$0xff] %vm1273_vm4, %v2269_v39  ;;  %v1766_v32 = vpop.f32.mrb[3].mxu1  ;;  %v1955_v7 = vmul.f32 %v2269_v39, %v2269_v39  ;;  %v1904_v26 = vsel %vm1273_vm4, %v2269_v39, 0.0 }
 0x2e2   : > { %1853 = vst.msk [vmem:[%s3932_s7 + $0x90] sm:$0xff] %vm1273_vm4, %v1766_v32  ;;  %v1902_v31 = vsel %vm1273_vm4, %v1766_v32, 0.0  ;;  %v1954_v36 = vmul.f32 %v1766_v32, %v1766_v32 }
 0x2e3   : > { %v1903_v25 = vadd.f32 %v1902_v31, %v1901_v53  ;;  %v2005_v10 = vsel %vm1273_vm4, %v1955_v7, 0.0 }
 0x2e4   : > { %v2003_v17 = vsel %vm1273_vm4, %v1954_v36, 0.0 }
 0x2e5   : > { %v2004_v60 = vadd.f32 %v2003_v17, %v2002_v57  ;;  %v1905_v58 = vadd.f32 %v1904_v26, %v1903_v25 }
 0x2e7   : > { %v2006_v22 = vadd.f32 %v2005_v10, %v2004_v60 }
 0x2f8   : > { %v2272_v49 = vpop.f32.mrb[4].mxu1 }
 0x2f9   : > { %1856 = vst.msk [vmem:[%s3932_s7 + $0xa8] sm:$0xff] %vm1273_vm4, %v2272_v49  ;;  %v1776_v4 = vpop.f32.mrb[5].mxu1  ;;  %v1957_v38 = vmul.f32 %v2272_v49, %v2272_v49  ;;  %v1908_v28 = vsel %vm1273_vm4, %v2272_v49, 0.0 }
 0x2fa   : > { %1855 = vst.msk [vmem:[%s3932_s7 + $0xa0] sm:$0xff] %vm1273_vm4, %v1776_v4  ;;  %v1906_v34 = vsel %vm1273_vm4, %v1776_v4, 0.0  ;;  %v1956_v1 = vmul.f32 %v1776_v4, %v1776_v4 }
 0x2fb   : > { %v1907_v47 = vadd.f32 %v1906_v34, %v1905_v58  ;;  %v2009_v11 = vsel %vm1273_vm4, %v1957_v38, 0.0 }
 0x2fc   : > { %v2007_v3 = vsel %vm1273_vm4, %v1956_v1, 0.0 }
 0x2fd   : > { %v2008_v44 = vadd.f32 %v2007_v3, %v2006_v22  ;;  %v1909_v27 = vadd.f32 %v1908_v28, %v1907_v47 }
 0x2ff   : > { %v2010_v13 = vadd.f32 %v2009_v11, %v2008_v44 }
 0x310   : > { %v2275_v23 = vpop.f32.mrb[6].mxu1 }
 0x311   : > { %1858 = vst.msk [vmem:[%s3932_s7 + $0xb8] sm:$0xff] %vm1273_vm4, %v2275_v23  ;;  %v1786_v43 = vpop.f32.mrb[7].mxu1  ;;  %v1959_v15 = vmul.f32 %v2275_v23, %v2275_v23  ;;  %v1912_v56 = vsel %vm1273_vm4, %v2275_v23, 0.0 }
 0x312   : > { %1857 = vst.msk [vmem:[%s3932_s7 + $0xb0] sm:$0xff] %vm1273_vm4, %v1786_v43  ;;  %v1910_v61 = vsel %vm1273_vm4, %v1786_v43, 0.0  ;;  %v1958_v40 = vmul.f32 %v1786_v43, %v1786_v43 }
 0x313   : > { %v1911_v29 = vadd.f32 %v1910_v61, %v1909_v27  ;;  %v2013_v30 = vsel %vm1273_vm4, %v1959_v15, 0.0 }
 0x314   : > { %v2011_v41 = vsel %vm1273_vm4, %v1958_v40, 0.0 }
 0x315   : > { %v2012_v2 = vadd.f32 %v2011_v41, %v2010_v13  ;;  %v1913_v51 = vadd.f32 %v1912_v56, %v1911_v29 }
 0x317   : > { %v2014_v46 = vadd.f32 %v2013_v30, %v2012_v2 }
 0x328   : > { %v2278_v55 = vpop.f32.mrb[8].mxu1 }
 0x329   : > { %1860 = vst.msk [vmem:[%s3932_s7 + $0xc8] sm:$0xff] %vm1273_vm4, %v2278_v55  ;;  %v1796_v20 = vpop.f32.mrb[9].mxu1  ;;  %v1961_v54 = vmul.f32 %v2278_v55, %v2278_v55  ;;  %v1916_v37 = vsel %vm1273_vm4, %v2278_v55, 0.0 }
 0x32a   : > { %1859 = vst.msk [vmem:[%s3932_s7 + $0xc0] sm:$0xff] %vm1273_vm4, %v1796_v20  ;;  %v1914_v6 = vsel %vm1273_vm4, %v1796_v20, 0.0  ;;  %v1960_v19 = vmul.f32 %v1796_v20, %v1796_v20 }
 0x32b   : > { %v1915_v8 = vadd.f32 %v1914_v6, %v1913_v51  ;;  %v2017_v42 = vsel %vm1273_vm4, %v1961_v54, 0.0 }
 0x32c   : > { %v2015_v62 = vsel %vm1273_vm4, %v1960_v19, 0.0 }
 0x32d   : > { %v2016_v5 = vadd.f32 %v2015_v62, %v2014_v46  ;;  %v1917_v50 = vadd.f32 %v1916_v37, %v1915_v8 }
 0x32f   : > { %v2018_v59 = vadd.f32 %v2017_v42, %v2016_v5 }
 0x340   : > { %v2281_v63 = vpop.f32.mrb[10].mxu1 }
 0x341   : > { %1862 = vst.msk [vmem:[%s3932_s7 + $0xd8] sm:$0xff] %vm1273_vm4, %v2281_v63  ;;  %v1806_v52 = vpop.f32.mrb[11].mxu1  ;;  %v1963_v0 = vmul.f32 %v2281_v63, %v2281_v63  ;;  %v1920_v12 = vsel %vm1273_vm4, %v2281_v63, 0.0 }
 0x342   : > { %1861 = vst.msk [vmem:[%s3932_s7 + $0xd0] sm:$0xff] %vm1273_vm4, %v1806_v52  ;;  %v1918_v18 = vsel %vm1273_vm4, %v1806_v52, 0.0  ;;  %v1962_v45 = vmul.f32 %v1806_v52, %v1806_v52 }
 0x343   : > { %v1919_v9 = vadd.f32 %v1918_v18, %v1917_v50  ;;  %v2021_v33 = vsel %vm1273_vm4, %v1963_v0, 0.0 }
 0x344   : > { %v2019_v14 = vsel %vm1273_vm4, %v1962_v45, 0.0 }
 0x345   : > { %v2020_v35 = vadd.f32 %v2019_v14, %v2018_v59  ;;  %v1921_v24 = vadd.f32 %v1920_v12, %v1919_v9 }
 0x347   : > { %v2022_v21 = vadd.f32 %v2021_v33, %v2020_v35 }
 0x358   : > { %v2284_v16 = vpop.f32.mrb[12].mxu1 }
 0x359   : > { %1864 = vst.msk [vmem:[%s3932_s7 + $0xe8] sm:$0xff] %vm1273_vm4, %v2284_v16  ;;  %v1816_v53 = vpop.f32.mrb[13].mxu1  ;;  %v1965_v48 = vmul.f32 %v2284_v16, %v2284_v16  ;;  %v1924_v7 = vsel %vm1273_vm4, %v2284_v16, 0.0 }
 0x35a   : > { %1863 = vst.msk [vmem:[%s3932_s7 + $0xe0] sm:$0xff] %vm1273_vm4, %v1816_v53  ;;  %v1922_v57 = vsel %vm1273_vm4, %v1816_v53, 0.0  ;;  %v1964_v39 = vmul.f32 %v1816_v53, %v1816_v53 }
 0x35b   : > { %v1923_v32 = vadd.f32 %v1922_v57, %v1921_v24  ;;  %v2025_v26 = vsel %vm1273_vm4, %v1965_v48, 0.0 }
 0x35c   : > { %v2023_v31 = vsel %vm1273_vm4, %v1964_v39, 0.0 }
 0x35d   : > { %v2024_v36 = vadd.f32 %v2023_v31, %v2022_v21  ;;  %v1925_v25 = vadd.f32 %v1924_v7, %v1923_v32 }
 0x35f   : > { %v2026_v17 = vadd.f32 %v2025_v26, %v2024_v36 }
 0x365   : > { %v2287_v60 = vpop.f32.mrb[14].mxu1 }
 0x366   : > { %1866 = vst.msk [vmem:[%s3932_s7 + $0xf8] sm:$0xff] %vm1273_vm4, %v2287_v60  ;;  %v1826_v58 = vpop.f32.mrb[15].mxu1  ;;  %v1967_v10 = vmul.f32 %v2287_v60, %v2287_v60  ;;  %v1928_v38 = vsel %vm1273_vm4, %v2287_v60, 0.0 }
 0x367   : > { %1865 = vst.msk [vmem:[%s3932_s7 + $0xf0] sm:$0xff] %vm1273_vm4, %v1826_v58  ;;  %v1926_v22 = vsel %vm1273_vm4, %v1826_v58, 0.0  ;;  %v1966_v49 = vmul.f32 %v1826_v58, %v1826_v58 }
 0x368   : > { %v1927_v4 = vadd.f32 %v1926_v22, %v1925_v25  ;;  %v2029_v28 = vsel %vm1273_vm4, %v1967_v10, 0.0 }
 0x369   : > { %v2027_v34 = vsel %vm1273_vm4, %v1966_v49, 0.0 }
 0x36a   : > { %v1929_v1 = vadd.f32 %v1928_v38, %v1927_v4  ;;  %v2028_v47 = vadd.f32 %v2027_v34, %v2026_v17 }
 0x36c   : > { %v1930_v3 = vrot.slane %v1929_v1, 4  ;;  %v2030_v44 = vadd.f32 %v2029_v28, %v2028_v47 }
 0x36e   : > { %v1931_v27 = vadd.f32 %v1930_v3, %v1929_v1  ;;  %v2031_v11 = vrot.slane %v2030_v44, 4 }
 0x370   : > { %v1932_v13 = vrot.slane %v1931_v27, 2  ;;  %v2032_v23 = vadd.f32 %v2031_v11, %v2030_v44 }
 0x372   : > { %v1933_v43 = vadd.f32 %v1932_v13, %v1931_v27  ;;  %v2033_v15 = vrot.slane %v2032_v23, 2 }
 0x374   : > { %v1934_v61 = vrot.slane %v1933_v43, 1  ;;  %v2034_v40 = vadd.f32 %v2033_v15, %v2032_v23 }
 0x376   : > { %v2035_v29 = vrot.slane %v2034_v40, 1  ;;  %v1935_v56 = vadd.f32 %v1934_v61, %v1933_v43 }
 0x378   : > { %v2036_v41 = vadd.f32 %v2035_v29, %v2034_v40 }
 0x37a   : > { %v2038_v2 = vsel %vm2037_vm12, %v1935_v56, %v2036_v41 }
 0x37b   : > { %2040 = vst.msk [vmem:[%s171_s9] sm:$0x3] %vm2039_vm13, %v2038_v2 }
 0x37c   : > { %2392 = shalt.err (!%p2389_p3)
}
 0x37d   : > { %s2393_s29 = scalar_lea.hbm %s4229_s19, 32  ;;  %s2397_s5 = scalar_lea.hbm %s4274_s3, 64 }
 0x37e   : > { %p2394_p4 = scmp.ne.s32.totalorder %s4229_s19, %s2393_s29  ;;  %p2398_p9 = scmp.lt.u32.totalorder %s4229_s19, %s4274_s3 }
 0x37f   : > { %p2399_p10 = scmp.lt.u32.totalorder %s2397_s5, %s2393_s29  ;;  %p2401_p12 = scmp.lt.u32.totalorder %s2393_s29, %s4229_s19 }
 0x380   : > { %p2395_p7 = pnand %p2394_p4, %p2510_p5 }
 0x381   : > { %p2400_p11 = por %p2399_p10, %p2398_p9 }
 0x382   : > { %p2396_p8 = pneg %p2395_p7 }
 0x383   : > { %p2402_p13 = por %p2401_p12, %p2400_p11 }
 0x385   : > { %p2403_p0 = pnand %p2402_p13, %p2396_p8 }
 0x387   : > { %2406 = shalt.err (!%p2403_p0)
}
 0x388   : > { %2303 = dma.vmem_to_hbm [thread:$0]  (%p2510_p5), %s4231_s10, 32, %s4229_s19, %s2047_s20  }
 0x389 PF: > { %p2309_p1 = scmp.ge.s32.totalorder %s2441_s15, 2  ;;  %s2083_s24 = sand.u32 1, %s2429_s12  }
 0x38a   : > { %s2084_s28 = scalar_lea.sflag [#allocation3], %s2083_s24 }
 0x38b   : > { %p2306_p2 = pnand %p2309_p1, %p2514_p6 }
 0x38d   : > { %2424 = dma.done.wait (!%p2306_p2), %s2084_s28, 32  }
 0x38e   : > { %2426 = vsyncadd (!%p2306_p2), %s2084_s28, 4294967264  ;;  %p14_p3 = scmp.ge.s32.totalorder %s2497_s18, 4   ;;  %s4513_s12 = smov %s2433_s13 }
 0x38f   : > { %s4514_s13 = smov %s2437_s14  ;;  %s4515_s14 = smov %s2508_s21 }
 0x390   : > { %s4516_s15 = smov %s2497_s18  ;;  %16 = sbr.rel (!%p14_p3) target bundleno = 3 (0x3), region = 75 }
 0x397   :  { %2089 = vsyncpa [#allocation3], 1 }
 0x398   :  { %2091 = vsyncpa [#allocation3 + $0x1], 1 }

</bundles_post_ra>
